<compile_context>
chip_gen: v5e
topology: v5e:2x2
jax: 0.10.0
libtpu: 0.0.40
codegen_flags: <defaults>
</compile_context>

<pallas_src>
import functools
import numpy as np
import jax
import jax.numpy as jnp
from jax.experimental import pallas as pl
from jax.experimental.pallas import tpu as pltpu

EPS = 1e-5  # torch BatchNorm2d default eps


# ----------------------------- Pallas kernels ---------------------------------

def _conv_block_kernel(x_ref, w3_ref, b1_ref, w1_ref, b2_ref, o_ref):
    # Fused conv_block: y = relu(x @ w3 + b1) ; z = y @ w1 + b2
    # (eval-mode BN scales pre-folded into w3/w1; biases carry the BN shift.)
    acc1 = jnp.dot(x_ref[...], w3_ref[...], preferred_element_type=jnp.float32)
    y = jnp.maximum(acc1 + b1_ref[...], 0.0).astype(jnp.bfloat16)   # cast early: halves live bytes
    acc2 = jnp.dot(y, w1_ref[...], preferred_element_type=jnp.float32)
    o_ref[...] = (acc2 + b2_ref[...]).astype(o_ref.dtype)           # bf16 activation writeback


def _conv_block_final_kernel(x_ref, w3_ref, b1_ref, w1_ref, b2_ref,
                             wf_ref, bf_ref, o_ref):
    # Last up-block + final 1x1 conv fused:  z = conv_block(x);  out = z @ wf + bf
    acc1 = jnp.dot(x_ref[...], w3_ref[...], preferred_element_type=jnp.float32)
    y = jnp.maximum(acc1 + b1_ref[...], 0.0).astype(jnp.bfloat16)
    acc2 = jnp.dot(y, w1_ref[...], preferred_element_type=jnp.float32)
    z = (acc2 + b2_ref[...]).astype(jnp.bfloat16)
    acc3 = jnp.dot(z, wf_ref[...], preferred_element_type=jnp.float32)
    o_ref[...] = acc3 + bf_ref[...]                                  # final output stays f32


# ----------------------------- Pallas wrappers ---------------------------------

def _pad_to(v, m):
    return ((v + m - 1) // m) * m


def _m_tile(M):
    # Cap the M tile at 256 rows (bounds the (TM,128) f32 intermediate / vreg spill
    # and v5e's single store slot) and use >=2 grid steps on the parallel axis when
    # possible so v7x's two TensorCores both run.
    Mp = _pad_to(M, 16)
    if Mp >= 32 and Mp % 32 == 0 and Mp // 2 <= 256:
        return Mp, Mp // 2
    if Mp <= 256:
        return Mp, Mp
    Mp = _pad_to(Mp, 256)
    return Mp, 256


def _pad_rows(x2d, Mp):
    M = x2d.shape[0]
    if Mp == M:
        return x2d                      # no copy at these shapes
    return jnp.pad(x2d, ((0, Mp - M), (0, 0)))   # fused by XLA under jit otherwise


def conv_block_pallas(x2d, prep, cout):
    """(M, K) bf16 activation -> (M, cout) bf16 output of a fused conv_block."""
    M, K = x2d.shape
    _, Cp = prep["w3"].shape            # w3 keeps true K rows; N padded to 128
    Mp, TM = _m_tile(M)
    xp = _pad_rows(x2d, Mp)
    out = pl.pallas_call(
        _conv_block_kernel,
        out_shape=jax.ShapeDtypeStruct((Mp, Cp), jnp.bfloat16),
        grid=(Mp // TM,),
        in_specs=[
            pl.BlockSpec((TM, K), lambda i: (i, 0)),   # K = full last dim (unpadded)
            pl.BlockSpec((K, Cp), lambda i: (0, 0)),
            pl.BlockSpec((1, Cp), lambda i: (0, 0)),
            pl.BlockSpec((Cp, Cp), lambda i: (0, 0)),
            pl.BlockSpec((1, Cp), lambda i: (0, 0)),
        ],
        out_specs=pl.BlockSpec((TM, Cp), lambda i: (i, 0)),
        compiler_params=pltpu.CompilerParams(dimension_semantics=("parallel",)),
    )(xp, prep["w3"], prep["b1"], prep["w1"], prep["b2"])
    return out[:M, :cout]


def conv_block_final_pallas(x2d, prep, prep_final, nc):
    """Last up-block + final 1x1 conv (with bias), fused.  Returns (M, nc) f32."""
    M, K = x2d.shape
    _, Cp = prep["w3"].shape
    _, Npf = prep_final["w"].shape
    Mp, TM = _m_tile(M)
    xp = _pad_rows(x2d, Mp)
    out = pl.pallas_call(
        _conv_block_final_kernel,
        out_shape=jax.ShapeDtypeStruct((Mp, Npf), jnp.float32),
        grid=(Mp // TM,),
        in_specs=[
            pl.BlockSpec((TM, K), lambda i: (i, 0)),
            pl.BlockSpec((K, Cp), lambda i: (0, 0)),
            pl.BlockSpec((1, Cp), lambda i: (0, 0)),
            pl.BlockSpec((Cp, Cp), lambda i: (0, 0)),
            pl.BlockSpec((1, Cp), lambda i: (0, 0)),
            pl.BlockSpec((Cp, Npf), lambda i: (0, 0)),
            pl.BlockSpec((1, Npf), lambda i: (0, 0)),
        ],
        out_specs=pl.BlockSpec((TM, Npf), lambda i: (i, 0)),
        compiler_params=pltpu.CompilerParams(dimension_semantics=("parallel",)),
    )(xp, prep["w3"], prep["b1"], prep["w1"], prep["b2"],
      prep_final["w"], prep_final["b"])
    return out[:M, :nc]


# ------------------------------- JAX glue -------------------------------------

def im2col_3x3(x, stride):
    """x: (N, H, W, C), padding=1, kernel 3x3 -> ((N*Ho*Wo, 9*C), (N, Ho, Wo))."""
    N, H, W, C = x.shape
    xp = jnp.pad(x, ((0, 0), (1, 1), (1, 1), (0, 0)))
    Ho = (H + 2 - 3) // stride + 1
    Wo = (W + 2 - 3) // stride + 1
    patches = []
    for dh in range(3):
        for dw in range(3):
            patches.append(
                xp[:, dh:dh + (Ho - 1) * stride + 1:stride,
                      dw:dw + (Wo - 1) * stride + 1:stride, :])
    cols = jnp.concatenate(patches, axis=-1)  # (N, Ho, Wo, 9*C)
    return cols.reshape(N * Ho * Wo, 9 * C), (N, Ho, Wo)
    # TODO(synk): replace im2col with an in-kernel 3x3 conv (9 accumulated matmuls
    #             over shifted windows) if run at realistic resolutions; the 9x
    #             activation-read expansion is negligible at 16x16.


@functools.lru_cache(maxsize=None)
def _upsample_matrix(n_in):
    # exact PyTorch bilinear align_corners=False source index: max((d+0.5)*0.5-0.5, 0)
    n_out = 2 * n_in
    dst = np.arange(n_out, dtype=np.float64)
    src = np.maximum((dst + 0.5) * 0.5 - 0.5, 0.0)
    i0 = np.floor(src).astype(np.int64)
    lam = src - i0
    i1 = np.minimum(i0 + 1, n_in - 1)
    m = np.zeros((n_out, n_in), np.float32)
    m[np.arange(n_out), i0] += (1.0 - lam)
    m[np.arange(n_out), i1] += lam
    return jnp.asarray(m)


def bilinear_upsample_2x(x):
    # x: (N, H, W, C) -> (N, 2H, 2W, C); interpolation weights are exact in bf16.
    N, H, W, C = x.shape
    uh = _upsample_matrix(H).astype(x.dtype)
    uw = _upsample_matrix(W).astype(x.dtype)
    y = jnp.einsum("oh,nhwc->nowc", uh, x)
    y = jnp.einsum("pw,nowc->nopc", uw, y)
    return y


def conv_block_fwd(x, prep_block, cout, stride, final=None):
    cols, (n, ho, wo) = im2col_3x3(x, stride)
    if final is None:
        z = conv_block_pallas(cols, prep_block, cout)
        return z.reshape(n, ho, wo, cout)
    prep_final, nc = final
    z = conv_block_final_pallas(cols, prep_block, prep_final, nc)
    return z.reshape(n, ho, wo, nc)


def unet_forward_nchw(x_nchw, prep, *, down_features, num_classes, pooling=False):
    x = jnp.transpose(x_nchw, (0, 2, 3, 1)).astype(jnp.bfloat16)   # NCHW -> NHWC, bf16
    final = (prep["final"], num_classes)
    n_ups = len(down_features) - 1

    if n_ups == 0:                       # degenerate Unet: expand + final only
        y = conv_block_fwd(x, prep["expand"], down_features[0], stride=1, final=final)
        return jnp.transpose(y, (0, 3, 1, 2))

    x = conv_block_fwd(x, prep["expand"], down_features[0], stride=1)
    down_stride = 1 if pooling else 2
    skips = []
    for p, cout in zip(prep["downs"], down_features[1:]):
        skips.append(x)
        x = conv_block_fwd(x, p, cout, stride=down_stride)
        # TODO(synk): pooling=True path (F.max_pool2d) not implemented; module built with pooling=False.

    up_features = list(down_features[::-1])
    up_iter = list(zip(prep["ups"], up_features[1:], reversed(skips)))
    for idx, (p, cout, skip) in enumerate(up_iter):
        x = jnp.concatenate([bilinear_upsample_2x(x), skip], axis=-1)
        blk_final = final if idx == len(up_iter) - 1 else None     # fuse final 1x1 into last block
        x = conv_block_fwd(x, p, cout, stride=1, final=blk_final)
    return jnp.transpose(x, (0, 3, 1, 2))                          # NHWC -> NCHW, f32


# -------------------- parameter init + one-time preparation ---------------------

def _init_bn(key, c):
    a, b, c_, d = jax.random.split(key, 4)
    return dict(
        gamma=1.0 + 0.1 * jax.random.normal(a, (c,), jnp.float32),
        beta=0.1 * jax.random.normal(b, (c,), jnp.float32),
        mean=0.1 * jax.random.normal(c_, (c,), jnp.float32),
        var=jax.random.uniform(d, (c,), jnp.float32, minval=0.5, maxval=1.5),
    )


def init_conv_block(key, cin, cout):
    k1, k2, k3, k4 = jax.random.split(key, 4)
    w3 = jax.random.normal(k1, (3, 3, cin, cout), jnp.float32) / np.sqrt(9 * cin)
    w1 = jax.random.normal(k2, (cout, cout), jnp.float32) / np.sqrt(cout)
    return dict(w3=w3, bn1=_init_bn(k3, cout), w1=w1, bn2=_init_bn(k4, cout))


def init_unet_params(key, in_channels, down_features, num_classes):
    n_down = len(down_features) - 1
    keys = jax.random.split(key, 2 * n_down + 3)
    ki = iter(keys)
    params = {}
    params["expand"] = init_conv_block(next(ki), in_channels, down_features[0])
    params["downs"] = [init_conv_block(next(ki), i, o)
                       for i, o in zip(down_features, down_features[1:])]
    up_features = down_features[::-1]
    params["ups"] = [init_conv_block(next(ki), i + o, o)
                     for i, o in zip(up_features, up_features[1:])]
    c0 = down_features[0]
    params["final_w"] = jax.random.normal(next(ki), (c0, num_classes),
                                          jnp.float32) / np.sqrt(c0)
    params["final_b"] = 0.1 * jax.random.normal(next(ki), (num_classes,),
                                                jnp.float32)
    return params


def fold_bn(bn):
    # eval-mode BatchNorm folded into a per-channel affine.
    # TODO(synk): train()-mode batch statistics not modeled; BN uses running stats.
    scale = bn["gamma"] / jnp.sqrt(bn["var"] + EPS)
    bias = bn["beta"] - bn["mean"] * scale
    return scale, bias


def prepare_conv_block(p):
    """Fold BN scales into weights, cast to bf16, pad ONLY the N (cout) side to 128.

    K (contraction) is kept at its true size: the kernel reads x with a full-last-dim
    block, so no padded activation copy is ever materialized per layer.
    """
    kh, kw, cin, cout = p["w3"].shape
    s1, b1 = fold_bn(p["bn1"])
    s2, b2 = fold_bn(p["bn2"])
    K = kh * kw * cin
    w3 = p["w3"].reshape(K, cout) * s1[None, :]
    w1 = p["w1"] * s2[None, :]
    Cp = _pad_to(cout, 128)
    return dict(
        w3=jnp.zeros((K, Cp), jnp.bfloat16).at[:, :cout].set(w3.astype(jnp.bfloat16)),
        b1=jnp.zeros((1, Cp), jnp.float32).at[0, :cout].set(b1.astype(jnp.float32)),
        w1=jnp.zeros((Cp, Cp), jnp.bfloat16)
              .at[:cout, :cout].set(w1.astype(jnp.bfloat16)),
        b2=jnp.zeros((1, Cp), jnp.float32).at[0, :cout].set(b2.astype(jnp.float32)),
    )


def prepare_final(wf, bf):
    c0, nc = wf.shape
    Cp, Npf = _pad_to(c0, 128), _pad_to(nc, 128)
    return dict(
        w=jnp.zeros((Cp, Npf), jnp.bfloat16).at[:c0, :nc].set(wf.astype(jnp.bfloat16)),
        b=jnp.zeros((1, Npf), jnp.float32).at[0, :nc].set(bf.astype(jnp.float32)),
    )


def prepare_params(raw):
    return dict(
        expand=prepare_conv_block(raw["expand"]),
        downs=[prepare_conv_block(p) for p in raw["downs"]],
        ups=[prepare_conv_block(p) for p in raw["ups"]],
        final=prepare_final(raw["final_w"], raw["final_b"]),
    )


# ----------------------------------- main --------------------------------------

if __name__ == "__main__":
    key = jax.random.PRNGKey(0)
    kx, kp = jax.random.split(key)

    in_channels, down_features, num_classes = 1, [4, 8], 3
    N, H, W = 2, 16, 16

    x_nchw = jax.random.normal(kx, (N, in_channels, H, W), jnp.float32)  # PyTorch NCHW
    raw_params = init_unet_params(kp, in_channels, down_features, num_classes)
    prep = prepare_params(raw_params)  # one-time: BN fold + bf16 cast + 128-lane pad

    fwd = jax.jit(functools.partial(
        unet_forward_nchw,
        down_features=tuple(down_features),
        num_classes=num_classes,
        pooling=False,
    ))

    out_nchw = fwd(x_nchw, prep)
    jax.block_until_ready(out_nchw)

    assert out_nchw.shape == (N, num_classes, H, W), out_nchw.shape
    assert out_nchw.dtype == jnp.float32, out_nchw.dtype
    assert bool(jnp.all(jnp.isfinite(out_nchw)))
    print("KERNEL_OK")
</pallas_src>

<mosaic_0001>
module attributes {stable_mosaic.version = 11 : i64} {
  func.func @_conv_block_kernel(%arg0: i32, %arg1: memref<256x9xbf16, #tpu.memory_space<vmem>>, %arg2: memref<9x128xbf16, #tpu.memory_space<vmem>>, %arg3: memref<1x128xf32, #tpu.memory_space<vmem>>, %arg4: memref<128x128xbf16, #tpu.memory_space<vmem>>, %arg5: memref<1x128xf32, #tpu.memory_space<vmem>>, %arg6: memref<256x128xbf16, #tpu.memory_space<vmem>>) attributes {dimension_semantics = [#tpu.dimension_semantics<parallel>], iteration_bounds = array<i64: 2>, scalar_prefetch = 0 : i64, scratch_operands = 0 : i64, tpu.core_type = #tpu.core_type<tc>, window_params = [{transform_indices = @transform_0, window_bounds = array<i64: 256, 9>}, {pipeline_mode = #tpu.pipeline_mode<synchronous>, transform_indices = @transform_1, window_bounds = array<i64: 9, 128>}, {pipeline_mode = #tpu.pipeline_mode<synchronous>, transform_indices = @transform_2, window_bounds = array<i64: 1, 128>}, {pipeline_mode = #tpu.pipeline_mode<synchronous>, transform_indices = @transform_3, window_bounds = array<i64: 128, 128>}, {pipeline_mode = #tpu.pipeline_mode<synchronous>, transform_indices = @transform_4, window_bounds = array<i64: 1, 128>}, {transform_indices = @transform_5, window_bounds = array<i64: 256, 128>}]} {
    %c0 = arith.constant 0 : index
    %c0_0 = arith.constant 0 : index
    %0 = vector.load %arg1[%c0, %c0_0] : memref<256x9xbf16, #tpu.memory_space<vmem>>, vector<256x9xbf16>
    %c0_1 = arith.constant 0 : index
    %c0_2 = arith.constant 0 : index
    %1 = vector.load %arg2[%c0_1, %c0_2] : memref<9x128xbf16, #tpu.memory_space<vmem>>, vector<9x128xbf16>
    %cst = arith.constant dense<0.000000e+00> : vector<256x128xf32>
    %2 = tpu.matmul %0, %1, %cst {dimension_numbers = #tpu.dot_dimension_numbers<[1], [0], [0], [1], [0, 0, 1, 1], [], []>} : vector<256x9xbf16>, vector<9x128xbf16>, vector<256x128xf32> -> vector<256x128xf32>
    %c0_3 = arith.constant 0 : index
    %c0_4 = arith.constant 0 : index
    %3 = vector.load %arg3[%c0_3, %c0_4] : memref<1x128xf32, #tpu.memory_space<vmem>>, vector<1x128xf32>
    %4 = vector.broadcast %3 : vector<1x128xf32> to vector<256x128xf32>
    %5 = arith.addf %2, %4 : vector<256x128xf32>
    %cst_5 = arith.constant 0.000000e+00 : f32
    %6 = vector.broadcast %cst_5 : f32 to vector<256x128xf32>
    %7 = arith.maximumf %5, %6 : vector<256x128xf32>
    %8 = arith.truncf %7 : vector<256x128xf32> to vector<256x128xbf16>
    %c0_6 = arith.constant 0 : index
    %c0_7 = arith.constant 0 : index
    %9 = vector.load %arg4[%c0_6, %c0_7] : memref<128x128xbf16, #tpu.memory_space<vmem>>, vector<128x128xbf16>
    %cst_8 = arith.constant dense<0.000000e+00> : vector<256x128xf32>
    %10 = tpu.matmul %8, %9, %cst_8 {dimension_numbers = #tpu.dot_dimension_numbers<[1], [0], [0], [1], [0, 0, 1, 1], [], []>} : vector<256x128xbf16>, vector<128x128xbf16>, vector<256x128xf32> -> vector<256x128xf32>
    %c0_9 = arith.constant 0 : index
    %c0_10 = arith.constant 0 : index
    %11 = vector.load %arg5[%c0_9, %c0_10] : memref<1x128xf32, #tpu.memory_space<vmem>>, vector<1x128xf32>
    %12 = vector.broadcast %11 : vector<1x128xf32> to vector<256x128xf32>
    %13 = arith.addf %10, %12 : vector<256x128xf32>
    %14 = arith.truncf %13 : vector<256x128xf32> to vector<256x128xbf16>
    %c0_11 = arith.constant 0 : index
    %c0_12 = arith.constant 0 : index
    %15 = vector.load %arg6[%c0_11, %c0_12] : memref<256x128xbf16, #tpu.memory_space<vmem>>, vector<256x128xbf16>
    tpu.vector_store %arg6[%c0_11, %c0_12], %14 {strides = array<i32>} : memref<256x128xbf16, #tpu.memory_space<vmem>>, vector<256x128xbf16>,
    return
  }
  func.func @transform_0(%arg0: i32) -> (i32, i32) {
    %c0_i32 = arith.constant 0 : i32
    %c0_i32_0 = arith.constant 0 : i32
    return %arg0, %c0_i32 : i32, i32
  }
  func.func @transform_1(%arg0: i32) -> (i32, i32) {
    %c0_i32 = arith.constant 0 : i32
    %c0_i32_0 = arith.constant 0 : i32
    %c0_i32_1 = arith.constant 0 : i32
    return %c0_i32, %c0_i32_0 : i32, i32
  }
  func.func @transform_2(%arg0: i32) -> (i32, i32) {
    %c0_i32 = arith.constant 0 : i32
    %c0_i32_0 = arith.constant 0 : i32
    %c0_i32_1 = arith.constant 0 : i32
    return %c0_i32, %c0_i32_0 : i32, i32
  }
  func.func @transform_3(%arg0: i32) -> (i32, i32) {
    %c0_i32 = arith.constant 0 : i32
    %c0_i32_0 = arith.constant 0 : i32
    %c0_i32_1 = arith.constant 0 : i32
    return %c0_i32, %c0_i32_0 : i32, i32
  }
  func.func @transform_4(%arg0: i32) -> (i32, i32) {
    %c0_i32 = arith.constant 0 : i32
    %c0_i32_0 = arith.constant 0 : i32
    %c0_i32_1 = arith.constant 0 : i32
    return %c0_i32, %c0_i32_0 : i32, i32
  }
  func.func @transform_5(%arg0: i32) -> (i32, i32) {
    %c0_i32 = arith.constant 0 : i32
    %c0_i32_0 = arith.constant 0 : i32
    return %arg0, %c0_i32 : i32, i32
  }
}

module attributes {stable_mosaic.version = 11 : i64} {
  func.func @_conv_block_kernel(%arg0: i32, %arg1: memref<64x36xbf16, #tpu.memory_space<vmem>>, %arg2: memref<36x128xbf16, #tpu.memory_space<vmem>>, %arg3: memref<1x128xf32, #tpu.memory_space<vmem>>, %arg4: memref<128x128xbf16, #tpu.memory_space<vmem>>, %arg5: memref<1x128xf32, #tpu.memory_space<vmem>>, %arg6: memref<64x128xbf16, #tpu.memory_space<vmem>>) attributes {dimension_semantics = [#tpu.dimension_semantics<parallel>], iteration_bounds = array<i64: 2>, scalar_prefetch = 0 : i64, scratch_operands = 0 : i64, tpu.core_type = #tpu.core_type<tc>, window_params = [{transform_indices = @transform_0, window_bounds = array<i64: 64, 36>}, {pipeline_mode = #tpu.pipeline_mode<synchronous>, transform_indices = @transform_1, window_bounds = array<i64: 36, 128>}, {pipeline_mode = #tpu.pipeline_mode<synchronous>, transform_indices = @transform_2, window_bounds = array<i64: 1, 128>}, {pipeline_mode = #tpu.pipeline_mode<synchronous>, transform_indices = @transform_3, window_bounds = array<i64: 128, 128>}, {pipeline_mode = #tpu.pipeline_mode<synchronous>, transform_indices = @transform_4, window_bounds = array<i64: 1, 128>}, {transform_indices = @transform_5, window_bounds = array<i64: 64, 128>}]} {
    %c0 = arith.constant 0 : index
    %c0_0 = arith.constant 0 : index
    %0 = vector.load %arg1[%c0, %c0_0] : memref<64x36xbf16, #tpu.memory_space<vmem>>, vector<64x36xbf16>
    %c0_1 = arith.constant 0 : index
    %c0_2 = arith.constant 0 : index
    %1 = vector.load %arg2[%c0_1, %c0_2] : memref<36x128xbf16, #tpu.memory_space<vmem>>, vector<36x128xbf16>
    %cst = arith.constant dense<0.000000e+00> : vector<64x128xf32>
    %2 = tpu.matmul %0, %1, %cst {dimension_numbers = #tpu.dot_dimension_numbers<[1], [0], [0], [1], [0, 0, 1, 1], [], []>} : vector<64x36xbf16>, vector<36x128xbf16>, vector<64x128xf32> -> vector<64x128xf32>
    %c0_3 = arith.constant 0 : index
    %c0_4 = arith.constant 0 : index
    %3 = vector.load %arg3[%c0_3, %c0_4] : memref<1x128xf32, #tpu.memory_space<vmem>>, vector<1x128xf32>
    %4 = vector.broadcast %3 : vector<1x128xf32> to vector<64x128xf32>
    %5 = arith.addf %2, %4 : vector<64x128xf32>
    %cst_5 = arith.constant 0.000000e+00 : f32
    %6 = vector.broadcast %cst_5 : f32 to vector<64x128xf32>
    %7 = arith.maximumf %5, %6 : vector<64x128xf32>
    %8 = arith.truncf %7 : vector<64x128xf32> to vector<64x128xbf16>
    %c0_6 = arith.constant 0 : index
    %c0_7 = arith.constant 0 : index
    %9 = vector.load %arg4[%c0_6, %c0_7] : memref<128x128xbf16, #tpu.memory_space<vmem>>, vector<128x128xbf16>
    %cst_8 = arith.constant dense<0.000000e+00> : vector<64x128xf32>
    %10 = tpu.matmul %8, %9, %cst_8 {dimension_numbers = #tpu.dot_dimension_numbers<[1], [0], [0], [1], [0, 0, 1, 1], [], []>} : vector<64x128xbf16>, vector<128x128xbf16>, vector<64x128xf32> -> vector<64x128xf32>
    %c0_9 = arith.constant 0 : index
    %c0_10 = arith.constant 0 : index
    %11 = vector.load %arg5[%c0_9, %c0_10] : memref<1x128xf32, #tpu.memory_space<vmem>>, vector<1x128xf32>
    %12 = vector.broadcast %11 : vector<1x128xf32> to vector<64x128xf32>
    %13 = arith.addf %10, %12 : vector<64x128xf32>
    %14 = arith.truncf %13 : vector<64x128xf32> to vector<64x128xbf16>
    %c0_11 = arith.constant 0 : index
    %c0_12 = arith.constant 0 : index
    %15 = vector.load %arg6[%c0_11, %c0_12] : memref<64x128xbf16, #tpu.memory_space<vmem>>, vector<64x128xbf16>
    tpu.vector_store %arg6[%c0_11, %c0_12], %14 {strides = array<i32>} : memref<64x128xbf16, #tpu.memory_space<vmem>>, vector<64x128xbf16>,
    return
  }
  func.func @transform_0(%arg0: i32) -> (i32, i32) {
    %c0_i32 = arith.constant 0 : i32
    %c0_i32_0 = arith.constant 0 : i32
    return %arg0, %c0_i32 : i32, i32
  }
  func.func @transform_1(%arg0: i32) -> (i32, i32) {
    %c0_i32 = arith.constant 0 : i32
    %c0_i32_0 = arith.constant 0 : i32
    %c0_i32_1 = arith.constant 0 : i32
    return %c0_i32, %c0_i32_0 : i32, i32
  }
  func.func @transform_2(%arg0: i32) -> (i32, i32) {
    %c0_i32 = arith.constant 0 : i32
    %c0_i32_0 = arith.constant 0 : i32
    %c0_i32_1 = arith.constant 0 : i32
    return %c0_i32, %c0_i32_0 : i32, i32
  }
  func.func @transform_3(%arg0: i32) -> (i32, i32) {
    %c0_i32 = arith.constant 0 : i32
    %c0_i32_0 = arith.constant 0 : i32
    %c0_i32_1 = arith.constant 0 : i32
    return %c0_i32, %c0_i32_0 : i32, i32
  }
  func.func @transform_4(%arg0: i32) -> (i32, i32) {
    %c0_i32 = arith.constant 0 : i32
    %c0_i32_0 = arith.constant 0 : i32
    %c0_i32_1 = arith.constant 0 : i32
    return %c0_i32, %c0_i32_0 : i32, i32
  }
  func.func @transform_5(%arg0: i32) -> (i32, i32) {
    %c0_i32 = arith.constant 0 : i32
    %c0_i32_0 = arith.constant 0 : i32
    return %arg0, %c0_i32 : i32, i32
  }
}

module attributes {stable_mosaic.version = 11 : i64} {
  func.func @_conv_block_final_kernel(%arg0: i32, %arg1: memref<256x108xbf16, #tpu.memory_space<vmem>>, %arg2: memref<108x128xbf16, #tpu.memory_space<vmem>>, %arg3: memref<1x128xf32, #tpu.memory_space<vmem>>, %arg4: memref<128x128xbf16, #tpu.memory_space<vmem>>, %arg5: memref<1x128xf32, #tpu.memory_space<vmem>>, %arg6: memref<128x128xbf16, #tpu.memory_space<vmem>>, %arg7: memref<1x128xf32, #tpu.memory_space<vmem>>, %arg8: memref<256x128xf32, #tpu.memory_space<vmem>>) attributes {dimension_semantics = [#tpu.dimension_semantics<parallel>], iteration_bounds = array<i64: 2>, scalar_prefetch = 0 : i64, scratch_operands = 0 : i64, tpu.core_type = #tpu.core_type<tc>, window_params = [{transform_indices = @transform_0, window_bounds = array<i64: 256, 108>}, {pipeline_mode = #tpu.pipeline_mode<synchronous>, transform_indices = @transform_1, window_bounds = array<i64: 108, 128>}, {pipeline_mode = #tpu.pipeline_mode<synchronous>, transform_indices = @transform_2, window_bounds = array<i64: 1, 128>}, {pipeline_mode = #tpu.pipeline_mode<synchronous>, transform_indices = @transform_3, window_bounds = array<i64: 128, 128>}, {pipeline_mode = #tpu.pipeline_mode<synchronous>, transform_indices = @transform_4, window_bounds = array<i64: 1, 128>}, {pipeline_mode = #tpu.pipeline_mode<synchronous>, transform_indices = @transform_5, window_bounds = array<i64: 128, 128>}, {pipeline_mode = #tpu.pipeline_mode<synchronous>, transform_indices = @transform_6, window_bounds = array<i64: 1, 128>}, {transform_indices = @transform_7, window_bounds = array<i64: 256, 128>}]} {
    %c0 = arith.constant 0 : index
    %c0_0 = arith.constant 0 : index
    %0 = vector.load %arg1[%c0, %c0_0] : memref<256x108xbf16, #tpu.memory_space<vmem>>, vector<256x108xbf16>
    %c0_1 = arith.constant 0 : index
    %c0_2 = arith.constant 0 : index
    %1 = vector.load %arg2[%c0_1, %c0_2] : memref<108x128xbf16, #tpu.memory_space<vmem>>, vector<108x128xbf16>
    %cst = arith.constant dense<0.000000e+00> : vector<256x128xf32>
    %2 = tpu.matmul %0, %1, %cst {dimension_numbers = #tpu.dot_dimension_numbers<[1], [0], [0], [1], [0, 0, 1, 1], [], []>} : vector<256x108xbf16>, vector<108x128xbf16>, vector<256x128xf32> -> vector<256x128xf32>
    %c0_3 = arith.constant 0 : index
    %c0_4 = arith.constant 0 : index
    %3 = vector.load %arg3[%c0_3, %c0_4] : memref<1x128xf32, #tpu.memory_space<vmem>>, vector<1x128xf32>
    %4 = vector.broadcast %3 : vector<1x128xf32> to vector<256x128xf32>
    %5 = arith.addf %2, %4 : vector<256x128xf32>
    %cst_5 = arith.constant 0.000000e+00 : f32
    %6 = vector.broadcast %cst_5 : f32 to vector<256x128xf32>
    %7 = arith.maximumf %5, %6 : vector<256x128xf32>
    %8 = arith.truncf %7 : vector<256x128xf32> to vector<256x128xbf16>
    %c0_6 = arith.constant 0 : index
    %c0_7 = arith.constant 0 : index
    %9 = vector.load %arg4[%c0_6, %c0_7] : memref<128x128xbf16, #tpu.memory_space<vmem>>, vector<128x128xbf16>
    %cst_8 = arith.constant dense<0.000000e+00> : vector<256x128xf32>
    %10 = tpu.matmul %8, %9, %cst_8 {dimension_numbers = #tpu.dot_dimension_numbers<[1], [0], [0], [1], [0, 0, 1, 1], [], []>} : vector<256x128xbf16>, vector<128x128xbf16>, vector<256x128xf32> -> vector<256x128xf32>
    %c0_9 = arith.constant 0 : index
    %c0_10 = arith.constant 0 : index
    %11 = vector.load %arg5[%c0_9, %c0_10] : memref<1x128xf32, #tpu.memory_space<vmem>>, vector<1x128xf32>
    %12 = vector.broadcast %11 : vector<1x128xf32> to vector<256x128xf32>
    %13 = arith.addf %10, %12 : vector<256x128xf32>
    %14 = arith.truncf %13 : vector<256x128xf32> to vector<256x128xbf16>
    %c0_11 = arith.constant 0 : index
    %c0_12 = arith.constant 0 : index
    %15 = vector.load %arg6[%c0_11, %c0_12] : memref<128x128xbf16, #tpu.memory_space<vmem>>, vector<128x128xbf16>
    %cst_13 = arith.constant dense<0.000000e+00> : vector<256x128xf32>
    %16 = tpu.matmul %14, %15, %cst_13 {dimension_numbers = #tpu.dot_dimension_numbers<[1], [0], [0], [1], [0, 0, 1, 1], [], []>} : vector<256x128xbf16>, vector<128x128xbf16>, vector<256x128xf32> -> vector<256x128xf32>
    %c0_14 = arith.constant 0 : index
    %c0_15 = arith.constant 0 : index
    %17 = vector.load %arg7[%c0_14, %c0_15] : memref<1x128xf32, #tpu.memory_space<vmem>>, vector<1x128xf32>
    %18 = vector.broadcast %17 : vector<1x128xf32> to vector<256x128xf32>
    %19 = arith.addf %16, %18 : vector<256x128xf32>
    %c0_16 = arith.constant 0 : index
    %c0_17 = arith.constant 0 : index
    %20 = vector.load %arg8[%c0_16, %c0_17] : memref<256x128xf32, #tpu.memory_space<vmem>>, vector<256x128xf32>
    tpu.vector_store %arg8[%c0_16, %c0_17], %19 {strides = array<i32>} : memref<256x128xf32, #tpu.memory_space<vmem>>, vector<256x128xf32>,
    return
  }
  func.func @transform_0(%arg0: i32) -> (i32, i32) {
    %c0_i32 = arith.constant 0 : i32
    %c0_i32_0 = arith.constant 0 : i32
    return %arg0, %c0_i32 : i32, i32
  }
  func.func @transform_1(%arg0: i32) -> (i32, i32) {
    %c0_i32 = arith.constant 0 : i32
    %c0_i32_0 = arith.constant 0 : i32
    %c0_i32_1 = arith.constant 0 : i32
    return %c0_i32, %c0_i32_0 : i32, i32
  }
  func.func @transform_2(%arg0: i32) -> (i32, i32) {
    %c0_i32 = arith.constant 0 : i32
    %c0_i32_0 = arith.constant 0 : i32
    %c0_i32_1 = arith.constant 0 : i32
    return %c0_i32, %c0_i32_0 : i32, i32
  }
  func.func @transform_3(%arg0: i32) -> (i32, i32) {
    %c0_i32 = arith.constant 0 : i32
    %c0_i32_0 = arith.constant 0 : i32
    %c0_i32_1 = arith.constant 0 : i32
    return %c0_i32, %c0_i32_0 : i32, i32
  }
  func.func @transform_4(%arg0: i32) -> (i32, i32) {
    %c0_i32 = arith.constant 0 : i32
    %c0_i32_0 = arith.constant 0 : i32
    %c0_i32_1 = arith.constant 0 : i32
    return %c0_i32, %c0_i32_0 : i32, i32
  }
  func.func @transform_5(%arg0: i32) -> (i32, i32) {
    %c0_i32 = arith.constant 0 : i32
    %c0_i32_0 = arith.constant 0 : i32
    %c0_i32_1 = arith.constant 0 : i32
    return %c0_i32, %c0_i32_0 : i32, i32
  }
  func.func @transform_6(%arg0: i32) -> (i32, i32) {
    %c0_i32 = arith.constant 0 : i32
    %c0_i32_0 = arith.constant 0 : i32
    %c0_i32_1 = arith.constant 0 : i32
    return %c0_i32, %c0_i32_0 : i32, i32
  }
  func.func @transform_7(%arg0: i32) -> (i32, i32) {
    %c0_i32 = arith.constant 0 : i32
    %c0_i32_0 = arith.constant 0 : i32
    return %arg0, %c0_i32 : i32, i32
  }
}

</mosaic_0001>

<bundles_post_ra>
// kernel: unet_forward_nchw.3
= control target key start
LH: loop header
LB: loop body
LE: loop exit
PB: predicated region body
PF: predicated region fallthrough
CT: control target
= control target key end

     0   :  { %s1128_s18 = smov 0   ;;  %s1308_s0 = inlined_call_operand.vmem [shape: bf16[512,9], index: 0, kind: input, shape index: {}]   ;;  %s1309_s1 = inlined_call_operand.vmem [shape: bf16[9,128], index: 1, kind: input, shape index: {}]   ;;  %s1310_s2 = inlined_call_operand.vmem [shape: f32[1,128], index: 2, kind: input, shape index: {}]   ;;  %s1311_s3 = inlined_call_operand.vmem [shape: bf16[128,128], index: 3, kind: input, shape index: {}]   ;;  %s1312_s4 = inlined_call_operand.vmem [shape: f32[1,128], index: 4, kind: input, shape index: {}]   ;;  %s1313_s5 = inlined_call_operand.vmem [shape: bf16[512,128], index: 5, kind: output, shape index: {}]  }
   0x1 LB: > { %s822_s19 = sadd.s32 4294967295, %s1095_s18   ;;  %p826_p0 = scmp.ge.s32.totalorder %s1095_s18, 1  ;;  %s1095_s18 = sphi %s1128_s18, %s15_s18  }
   0x2   : > { %p188_p1 = scmp.lt.s32.totalorder %s1095_s18, 3 }
   0x4   : > { %p189_p2 = pnand %p826_p0, %p188_p1 }
   0x5   : > { %s827_s24 = sshll.u32 (!%p189_p2), %s822_s19, 5 }
   0x6   : > { %192 = sbr.rel (%p189_p2) target bundleno = 545 (0x221), region = 40  ;;  %p217_p3 = scmp.lt.s32.totalorder (!%p189_p2), %s827_s24, 63 }
   0xb   : > { %v897_v0 = vld [vmem:[%s1309_s1] sm:$0xf]  ;;  %v965_v1 = vld [vmem:[%s1309_s1] sm:$0x10]  ;;  %vm401_vm0 = vcmask 1043456   ;;  %vm402_vm1 = vcmask 1044480  }
   0xc   : > { %v898_v2 = vor.u32 %v965_v1, %v897_v0  ;;  %v1097_v3 = vmov 65535   ;;  %s1315_s24 = smov (!%p217_p3, %s827_s24), 63  ;;  %vm352_vm2 = vcmask 72704   ;;  %v973_v12 = vld [vmem:[%s1311_s3 + $0x38] sm:$0xff]  ;;  %v972_v14 = vld [vmem:[%s1311_s3 + $0x30] sm:$0xff]  ;;  %v971_v15 = vld [vmem:[%s1311_s3 + $0x28] sm:$0xff] }
   0xd   : > { %v403_v4 = vsel %vm401_vm0, 4294967295, %v1097_v3  ;;  %s828_s25 = sshll.u32 %s1315_s24, 2  ;;  %613 = vmatpush.bf16.msra.mxu1 %v973_v12  ;;  %1070 = vmatpush.bf16.msra.mxu2 %v973_v12  ;;  %v970_v16 = vld [vmem:[%s1311_s3 + $0x20] sm:$0xff]  ;;  %v969_v17 = vld [vmem:[%s1311_s3 + $0x18] sm:$0xff]  ;;  %v968_v19 = vld [vmem:[%s1311_s3 + $0x10] sm:$0xff] }
   0xe   : > { %v404_v5 = vsel %vm402_vm1, %v403_v4, 0  ;;  %s1150_s28 = scalar_lea.vmem %s1308_s0, %s828_s25  ;;  %v967_v21 = vld [vmem:[%s1311_s3 + $0x8] sm:$0xff]  ;;  %v966_v22 = vld [vmem:[%s1311_s3] sm:$0xff]  ;;  %s1245_s29 = scalar_lea.vmem %s1313_s5, %s828_s25 }
   0xf   : > { %v406_v6 = vand.u32 %v898_v2, %v404_v5  ;;  %v949_v7 = vld [vmem:[%s1150_s28] sm:$0xff]  ;;  %v950_v8 = vld [vmem:[%s1150_s28 + $0x8] sm:$0xff]  ;;  %v951_v9 = vld [vmem:[%s1150_s28 + $0x10] sm:$0xff] }
  0x10   : > { %v952_v10 = vld [vmem:[%s1150_s28 + $0x18] sm:$0xff]  ;;  %v953_v11 = vld [vmem:[%s1150_s28 + $0x20] sm:$0xff]  ;;  %v954_v13 = vld [vmem:[%s1150_s28 + $0x28] sm:$0xff] }
  0x11   : > { %415 = vmatpush.bf16.msra.mxu0 %v406_v6  ;;  %1069 = vmatpush.bf16.msra.mxu3 %v406_v6  ;;  %v955_v18 = vld [vmem:[%s1150_s28 + $0x30] sm:$0xff]  ;;  %v958_v20 = vld [vmem:[%s1150_s28 + $0x48] sm:$0xff]  ;;  %v956_v23 = vld [vmem:[%s1150_s28 + $0x38] sm:$0xff] }
  0x12   : > { %614 = vmatpush.bf16.msra.mxu1 %v972_v14  ;;  %1071 = vmatpush.bf16.msra.mxu2 %v972_v14  ;;  %v959_v24 = vld [vmem:[%s1150_s28 + $0x50] sm:$0xff]  ;;  %v957_v25 = vld [vmem:[%s1150_s28 + $0x40] sm:$0xff]  ;;  %v960_v28 = vld [vmem:[%s1150_s28 + $0x58] sm:$0xff] }
  0x13   : > { %v1200_v27 = vld [vmem:[%s1310_s2] ss:$0 sm:$0xff]  ;;  %v962_v44 = vld [vmem:[%s1150_s28 + $0x68] sm:$0xff]  ;;  %v963_v52 = vld [vmem:[%s1150_s28 + $0x70] sm:$0xff] }
  0x14   : > { %899 = vmatmul.msk.bf16.vlgmr.msra.gmra.mxu0 %vm352_vm2, %v949_v7  ;;  %908 = vmatmul.msk.bf16.vlgmr.msra.gmra.mxu3 %vm352_vm2, %v958_v20  ;;  %v961_v36 = vld [vmem:[%s1150_s28 + $0x60] sm:$0xff]  ;;  %v964_v60 = vld [vmem:[%s1150_s28 + $0x78] sm:$0xff] }
  0x16   : > { %615 = vmatpush.bf16.msra.mxu1 %v971_v15  ;;  %1072 = vmatpush.bf16.msra.mxu2 %v971_v15 }
  0x1a   : > { %616 = vmatpush.bf16.msra.mxu1 %v970_v16  ;;  %1073 = vmatpush.bf16.msra.mxu2 %v970_v16 }
  0x1e   : > { %617 = vmatpush.bf16.msra.mxu1 %v969_v17  ;;  %1074 = vmatpush.bf16.msra.mxu2 %v969_v17 }
  0x22   : > { %618 = vmatpush.bf16.msra.mxu1 %v968_v19  ;;  %1075 = vmatpush.bf16.msra.mxu2 %v968_v19 }
  0x24   : > { %900 = vmatmul.msk.bf16.gmra.mxu0 %vm352_vm2, %v950_v8  ;;  %909 = vmatmul.msk.bf16.gmra.mxu3 %vm352_vm2, %v959_v24 }
  0x26   : > { %619 = vmatpush.bf16.msra.mxu1 %v967_v21  ;;  %1076 = vmatpush.bf16.msra.mxu2 %v967_v21 }
  0x2a   : > { %620 = vmatpush.bf16.msra.mxu1 %v966_v22  ;;  %1077 = vmatpush.bf16.msra.mxu2 %v966_v22 }
  0x34   : > { %901 = vmatmul.msk.bf16.gmra.mxu0 %vm352_vm2, %v951_v9  ;;  %910 = vmatmul.msk.bf16.gmra.mxu3 %vm352_vm2, %v960_v28 }
  0x44   : > { %902 = vmatmul.msk.bf16.gmra.mxu0 %vm352_vm2, %v952_v10  ;;  %911 = vmatmul.msk.bf16.gmra.mxu3 %vm352_vm2, %v961_v36 }
  0x54   : > { %903 = vmatmul.msk.bf16.gmra.mxu0 %vm352_vm2, %v953_v11  ;;  %912 = vmatmul.msk.bf16.gmra.mxu3 %vm352_vm2, %v962_v44 }
  0x64   : > { %904 = vmatmul.msk.bf16.gmra.mxu0 %vm352_vm2, %v954_v13  ;;  %913 = vmatmul.msk.bf16.gmra.mxu3 %vm352_vm2, %v963_v52 }
  0x74   : > { %905 = vmatmul.msk.bf16.gmra.mxu0 %vm352_vm2, %v955_v18  ;;  %914 = vmatmul.msk.bf16.gmra.mxu3 %vm352_vm2, %v964_v60 }
  0x84   : > { %906 = vmatmul.msk.bf16.gmra.mxu0 %vm352_vm2, %v956_v23 }
  0x91   : > { %v417_v26 = vpop.f32.mrf.mxu0 }
  0x92   : > { %v418_v29 = vadd.f32 %v1200_v27, %v417_v26 }
  0x94   : > { %907 = vmatmul.msk.bf16.gmra.mxu0 %vm352_vm2, %v957_v25  ;;  %v497_v32 = vmax.f32 %v418_v29, 0.0 }
  0x97   : > { %v462_v18 = vpop.f32.mrf.mxu3 }
  0x99   : > { %v419_v30 = vpop.f32.mrf.mxu0 }
  0x9a   : > { %v420_v31 = vadd.f32 %v1200_v27, %v419_v30 }
  0x9c   : > { %v498_v33 = vmax.f32 %v420_v31, 0.0 }
  0x9e   : > { %v529_v34 = vpack.c.bf16 %v498_v33, %v497_v32 }
  0x9f   : > { %v464_v22 = vpop.f32.mrf.mxu3 }
  0xa0   : > { %621 = vmatmul.bf16.vlgmr.msra.gmra.mxu1 %v529_v34 }
  0xa1   : > { %v422_v35 = vpop.f32.mrf.mxu0 }
  0xa2   : > { %v423_v37 = vadd.f32 %v1200_v27, %v422_v35 }
  0xa4   : > { %v499_v40 = vmax.f32 %v423_v37, 0.0  ;;  %v1234_v37 = vld [vmem:[%s1312_s4] ss:$0 sm:$0xff] }
  0xa7   : > { %v467_v28 = vpop.f32.mrf.mxu3 }
  0xa9   : > { %v424_v38 = vpop.f32.mrf.mxu0 }
  0xaa   : > { %v425_v39 = vadd.f32 %v1200_v27, %v424_v38 }
  0xac   : > { %v500_v41 = vmax.f32 %v425_v39, 0.0  ;;  %v463_v39 = vadd.f32 %v1200_v27, %v462_v18 }
  0xae   : > { %v530_v42 = vpack.c.bf16 %v500_v41, %v499_v40  ;;  %v465_v41 = vadd.f32 %v1200_v27, %v464_v22 }
  0xaf   : > { %v469_v36 = vpop.f32.mrf.mxu3 }
  0xb0   : > { %626 = vmatmul.bf16.gmra.mxu1 %v530_v42 }
  0xb1   : > { %v427_v43 = vpop.f32.mrf.mxu0 }
  0xb2   : > { %v428_v45 = vadd.f32 %v1200_v27, %v427_v43 }
  0xb4   : > { %v501_v48 = vmax.f32 %v428_v45, 0.0  ;;  %v515_v45 = vmax.f32 %v463_v39, 0.0 }
  0xb7   : > { %v472_v44 = vpop.f32.mrf.mxu3 }
  0xb9   : > { %v429_v46 = vpop.f32.mrf.mxu0 }
  0xba   : > { %v430_v47 = vadd.f32 %v1200_v27, %v429_v46  ;;  %v516_v46 = vmax.f32 %v465_v41, 0.0 }
  0xbc   : > { %v502_v49 = vmax.f32 %v430_v47, 0.0 }
  0xbe   : > { %v531_v50 = vpack.c.bf16 %v502_v49, %v501_v48  ;;  %v538_v48 = vpack.c.bf16 %v516_v46, %v515_v45 }
  0xbf   : > { %v474_v49 = vpop.f32.mrf.mxu3 }
  0xc0   : > { %631 = vmatmul.bf16.gmra.mxu1 %v531_v50 }
  0xc1   : > { %v432_v51 = vpop.f32.mrf.mxu0 }
  0xc2   : > { %v433_v53 = vadd.f32 %v1200_v27, %v432_v51  ;;  %v468_v51 = vadd.f32 %v1200_v27, %v467_v28 }
  0xc4   : > { %v503_v56 = vmax.f32 %v433_v53, 0.0  ;;  %v470_v53 = vadd.f32 %v1200_v27, %v469_v36 }
  0xc9   : > { %v434_v54 = vpop.f32.mrf.mxu0 }
  0xca   : > { %v435_v55 = vadd.f32 %v1200_v27, %v434_v54 }
  0xcc   : > { %v504_v57 = vmax.f32 %v435_v55, 0.0 }
  0xce   : > { %v532_v58 = vpack.c.bf16 %v504_v57, %v503_v56  ;;  %v517_v56 = vmax.f32 %v468_v51, 0.0  ;;  %v518_v57 = vmax.f32 %v470_v53, 0.0 }
  0xd0   : > { %636 = vmatmul.bf16.gmra.mxu1 %v532_v58  ;;  %v539_v60 = vpack.c.bf16 %v518_v57, %v517_v56 }
  0xd1   : > { %v437_v59 = vpop.f32.mrf.mxu0 }
  0xd2   : > { %v438_v61 = vadd.f32 %v1200_v27, %v437_v59  ;;  %v477_v59 = vpop.f32.mrf.mxu3 }
  0xd4   : > { %v505_v0 = vmax.f32 %v438_v61, 0.0 }
  0xd9   : > { %v439_v62 = vpop.f32.mrf.mxu0 }
  0xda   : > { %v440_v63 = vadd.f32 %v1200_v27, %v439_v62  ;;  %v473_v62 = vadd.f32 %v1200_v27, %v472_v44 }
  0xdc   : > { %v506_v1 = vmax.f32 %v440_v63, 0.0 }
  0xde   : > { %v533_v2 = vpack.c.bf16 %v506_v1, %v505_v0  ;;  %v475_v0 = vadd.f32 %v1200_v27, %v474_v49 }
  0xe0   : > { %641 = vmatmul.bf16.gmra.mxu1 %v533_v2  ;;  %v479_v2 = vpop.f32.mrf.mxu3 }
  0xe1   : > { %v442_v3 = vpop.f32.mrf.mxu0 }
  0xe2   : > { %v443_v4 = vadd.f32 %v1200_v27, %v442_v3 }
  0xe4   : > { %v507_v7 = vmax.f32 %v443_v4, 0.0  ;;  %v519_v4 = vmax.f32 %v473_v62, 0.0 }
  0xe9   : > { %v444_v5 = vpop.f32.mrf.mxu0 }
  0xea   : > { %v445_v6 = vadd.f32 %v1200_v27, %v444_v5  ;;  %v520_v5 = vmax.f32 %v475_v0, 0.0 }
  0xec   : > { %v508_v8 = vmax.f32 %v445_v6, 0.0 }
  0xee   : > { %v534_v9 = vpack.c.bf16 %v508_v8, %v507_v7  ;;  %v540_v7 = vpack.c.bf16 %v520_v5, %v519_v4  ;;  %v482_v8 = vpop.f32.mrf.mxu3 }
  0xef   : > { %v483_v22 = vadd.f32 %v1200_v27, %v482_v8 }
  0xf0   : > { %646 = vmatmul.bf16.gmra.mxu1 %v534_v9 }
  0xf1   : > { %v447_v10 = vpop.f32.mrf.mxu0  ;;  %v523_v28 = vmax.f32 %v483_v22, 0.0 }
  0xf2   : > { %v448_v11 = vadd.f32 %v1200_v27, %v447_v10  ;;  %v478_v10 = vadd.f32 %v1200_v27, %v477_v59 }
  0xf4   : > { %v509_v14 = vmax.f32 %v448_v11, 0.0 }
  0xf9   : > { %v449_v12 = vpop.f32.mrf.mxu0 }
  0xfa   : > { %v450_v13 = vadd.f32 %v1200_v27, %v449_v12  ;;  %v480_v12 = vadd.f32 %v1200_v27, %v479_v2 }
  0xfc   : > { %v510_v15 = vmax.f32 %v450_v13, 0.0 }
  0xfe   : > { %v535_v16 = vpack.c.bf16 %v510_v15, %v509_v14  ;;  %v521_v15 = vmax.f32 %v478_v10, 0.0 }
 0x100   : > { %651 = vmatmul.bf16.gmra.mxu1 %v535_v16  ;;  %v522_v16 = vmax.f32 %v480_v12, 0.0 }
 0x101   : > { %v452_v17 = vpop.f32.mrf.mxu0 }
 0x102   : > { %v453_v19 = vadd.f32 %v1200_v27, %v452_v17  ;;  %v484_v17 = vpop.f32.mrf.mxu3 }
 0x104   : > { %v511_v23 = vmax.f32 %v453_v19, 0.0  ;;  %v541_v19 = vpack.c.bf16 %v522_v16, %v521_v15 }
 0x109   : > { %v454_v20 = vpop.f32.mrf.mxu0 }
 0x10a   : > { %v455_v21 = vadd.f32 %v1200_v27, %v454_v20 }
 0x10c   : > { %v512_v24 = vmax.f32 %v455_v21, 0.0  ;;  %v487_v21 = vpop.f32.mrf.mxu3 }
 0x10e   : > { %v536_v25 = vpack.c.bf16 %v512_v24, %v511_v23  ;;  %v485_v24 = vadd.f32 %v1200_v27, %v484_v17 }
 0x110   : > { %656 = vmatmul.bf16.gmra.mxu1 %v536_v25 }
 0x111   : > { %v457_v26 = vpop.f32.mrf.mxu0 }
 0x112   : > { %v458_v29 = vadd.f32 %v1200_v27, %v457_v26 }
 0x114   : > { %v513_v32 = vmax.f32 %v458_v29, 0.0  ;;  %v524_v29 = vmax.f32 %v485_v24, 0.0 }
 0x119   : > { %v459_v30 = vpop.f32.mrf.mxu0 }
 0x11a   : > { %v460_v31 = vadd.f32 %v1200_v27, %v459_v30 }
 0x11c   : > { %v514_v33 = vmax.f32 %v460_v31, 0.0  ;;  %v542_v31 = vpack.c.bf16 %v524_v29, %v523_v28 }
 0x11d   : > { %v622_v34 = vpop.f32.mrf.mxu1 }
 0x11e   : > { %v537_v35 = vpack.c.bf16 %v514_v33, %v513_v32  ;;  %v623_v40 = vadd.f32 %v1234_v37, %v622_v34  ;;  %v489_v32 = vpop.f32.mrf.mxu3  ;;  %v488_v34 = vadd.f32 %v1200_v27, %v487_v21 }
 0x11f   : > { %v490_v36 = vadd.f32 %v1200_v27, %v489_v32 }
 0x120   : > { %661 = vmatmul.bf16.vlgmr.msra.gmra.mxu2 %v537_v35  ;;  %v525_v41 = vmax.f32 %v488_v34, 0.0 }
 0x125   : > { %v624_v38 = vpop.f32.mrf.mxu1 }
 0x126   : > { %v625_v42 = vadd.f32 %v1234_v37, %v624_v38 }
 0x128   : > { %v977_v43 = vpack.c.bf16 %v625_v42, %v623_v40  ;;  %v492_v40 = vpop.f32.mrf.mxu3  ;;  %v526_v42 = vmax.f32 %v490_v36, 0.0 }
 0x12a   : > { %978 = vst [vmem:[%s1245_s29] sm:$0xff] %v977_v43   ;;  %v543_v44 = vpack.c.bf16 %v526_v42, %v525_v41 }
 0x12d   : > { %v627_v47 = vpop.f32.mrf.mxu1 }
 0x12e   : > { %v628_v52 = vadd.f32 %v1234_v37, %v627_v47  ;;  %v493_v47 = vadd.f32 %v1200_v27, %v492_v40 }
 0x130   : > { %666 = vmatmul.bf16.gmra.mxu2 %v538_v48  ;;  %v494_v45 = vpop.f32.mrf.mxu3 }
 0x131   : > { %v495_v49 = vadd.f32 %v1200_v27, %v494_v45 }
 0x133   : > { %v528_v53 = vmax.f32 %v495_v49, 0.0 }
 0x135   : > { %v629_v50 = vpop.f32.mrf.mxu1 }
 0x136   : > { %v630_v54 = vadd.f32 %v1234_v37, %v629_v50 }
 0x138   : > { %v982_v55 = vpack.c.bf16 %v630_v54, %v628_v52  ;;  %v527_v52 = vmax.f32 %v493_v47, 0.0 }
 0x13a   : > { %1054 = vst [vmem:[%s1245_s29 + $0x8] sm:$0xff] %v982_v55   ;;  %v544_v55 = vpack.c.bf16 %v528_v53, %v527_v52 }
 0x13d   : > { %v632_v58 = vpop.f32.mrf.mxu1 }
 0x13e   : > { %v633_v63 = vadd.f32 %v1234_v37, %v632_v58 }
 0x140   : > { %671 = vmatmul.bf16.gmra.mxu2 %v539_v60 }
 0x145   : > { %v634_v61 = vpop.f32.mrf.mxu1 }
 0x146   : > { %v635_v1 = vadd.f32 %v1234_v37, %v634_v61 }
 0x148   : > { %v987_v3 = vpack.c.bf16 %v635_v1, %v633_v63 }
 0x14a   : > { %1055 = vst [vmem:[%s1245_s29 + $0x10] sm:$0xff] %v987_v3  }
 0x14d   : > { %v637_v6 = vpop.f32.mrf.mxu1 }
 0x14e   : > { %v638_v11 = vadd.f32 %v1234_v37, %v637_v6 }
 0x150   : > { %676 = vmatmul.bf16.gmra.mxu2 %v540_v7 }
 0x155   : > { %v639_v9 = vpop.f32.mrf.mxu1 }
 0x156   : > { %v640_v13 = vadd.f32 %v1234_v37, %v639_v9 }
 0x158   : > { %v992_v14 = vpack.c.bf16 %v640_v13, %v638_v11 }
 0x15a   : > { %1056 = vst [vmem:[%s1245_s29 + $0x18] sm:$0xff] %v992_v14  }
 0x15d   : > { %v642_v18 = vpop.f32.mrf.mxu1 }
 0x15e   : > { %v643_v23 = vadd.f32 %v1234_v37, %v642_v18 }
 0x160   : > { %681 = vmatmul.bf16.gmra.mxu2 %v541_v19 }
 0x165   : > { %v644_v20 = vpop.f32.mrf.mxu1 }
 0x166   : > { %v645_v25 = vadd.f32 %v1234_v37, %v644_v20 }
 0x168   : > { %v997_v26 = vpack.c.bf16 %v645_v25, %v643_v23 }
 0x16a   : > { %1057 = vst [vmem:[%s1245_s29 + $0x20] sm:$0xff] %v997_v26  }
 0x16d   : > { %v647_v30 = vpop.f32.mrf.mxu1 }
 0x16e   : > { %v648_v35 = vadd.f32 %v1234_v37, %v647_v30 }
 0x170   : > { %686 = vmatmul.bf16.gmra.mxu2 %v542_v31 }
 0x175   : > { %v649_v33 = vpop.f32.mrf.mxu1 }
 0x176   : > { %v650_v38 = vadd.f32 %v1234_v37, %v649_v33 }
 0x178   : > { %v1002_v39 = vpack.c.bf16 %v650_v38, %v648_v35 }
 0x17a   : > { %1058 = vst [vmem:[%s1245_s29 + $0x28] sm:$0xff] %v1002_v39  }
 0x17d   : > { %v652_v43 = vpop.f32.mrf.mxu1 }
 0x17e   : > { %v653_v48 = vadd.f32 %v1234_v37, %v652_v43 }
 0x180   : > { %691 = vmatmul.bf16.gmra.mxu2 %v543_v44 }
 0x185   : > { %v654_v46 = vpop.f32.mrf.mxu1 }
 0x186   : > { %v655_v50 = vadd.f32 %v1234_v37, %v654_v46 }
 0x188   : > { %v1007_v51 = vpack.c.bf16 %v655_v50, %v653_v48 }
 0x18a   : > { %1059 = vst [vmem:[%s1245_s29 + $0x30] sm:$0xff] %v1007_v51  }
 0x18d   : > { %v657_v54 = vpop.f32.mrf.mxu1 }
 0x18e   : > { %v658_v57 = vadd.f32 %v1234_v37, %v657_v54 }
 0x190   : > { %696 = vmatmul.bf16.gmra.mxu2 %v544_v55 }
 0x195   : > { %v659_v56 = vpop.f32.mrf.mxu1 }
 0x196   : > { %v660_v58 = vadd.f32 %v1234_v37, %v659_v56 }
 0x198   : > { %v1012_v59 = vpack.c.bf16 %v660_v58, %v658_v57 }
 0x19a   : > { %1060 = vst [vmem:[%s1245_s29 + $0x38] sm:$0xff] %v1012_v59  }
 0x1a3   : > { %v662_v60 = vpop.f32.mrf.mxu2 }
 0x1a4   : > { %v663_v61 = vadd.f32 %v1234_v37, %v662_v60 }
 0x1ab   : > { %v664_v27 = vpop.f32.mrf.mxu2 }
 0x1ac   : > { %v665_v62 = vadd.f32 %v1234_v37, %v664_v27 }
 0x1ae   : > { %v1017_v63 = vpack.c.bf16 %v665_v62, %v663_v61 }
 0x1b0   : > { %1061 = vst [vmem:[%s1245_s29 + $0x40] sm:$0xff] %v1017_v63  }
 0x1b3   : > { %v667_v0 = vpop.f32.mrf.mxu2 }
 0x1b4   : > { %v668_v2 = vadd.f32 %v1234_v37, %v667_v0 }
 0x1bb   : > { %v669_v1 = vpop.f32.mrf.mxu2 }
 0x1bc   : > { %v670_v3 = vadd.f32 %v1234_v37, %v669_v1 }
 0x1be   : > { %v1022_v4 = vpack.c.bf16 %v670_v3, %v668_v2 }
 0x1c0   : > { %1062 = vst [vmem:[%s1245_s29 + $0x48] sm:$0xff] %v1022_v4  }
 0x1c3   : > { %v672_v5 = vpop.f32.mrf.mxu2 }
 0x1c4   : > { %v673_v7 = vadd.f32 %v1234_v37, %v672_v5 }
 0x1cb   : > { %v674_v6 = vpop.f32.mrf.mxu2 }
 0x1cc   : > { %v675_v8 = vadd.f32 %v1234_v37, %v674_v6 }
 0x1ce   : > { %v1027_v9 = vpack.c.bf16 %v675_v8, %v673_v7 }
 0x1d0   : > { %1063 = vst [vmem:[%s1245_s29 + $0x50] sm:$0xff] %v1027_v9  }
 0x1d3   : > { %v677_v10 = vpop.f32.mrf.mxu2 }
 0x1d4   : > { %v678_v12 = vadd.f32 %v1234_v37, %v677_v10 }
 0x1db   : > { %v679_v11 = vpop.f32.mrf.mxu2 }
 0x1dc   : > { %v680_v13 = vadd.f32 %v1234_v37, %v679_v11 }
 0x1de   : > { %v1032_v14 = vpack.c.bf16 %v680_v13, %v678_v12 }
 0x1e0   : > { %1064 = vst [vmem:[%s1245_s29 + $0x58] sm:$0xff] %v1032_v14  }
 0x1e3   : > { %v682_v15 = vpop.f32.mrf.mxu2 }
 0x1e4   : > { %v683_v17 = vadd.f32 %v1234_v37, %v682_v15 }
 0x1eb   : > { %v684_v16 = vpop.f32.mrf.mxu2 }
 0x1ec   : > { %v685_v18 = vadd.f32 %v1234_v37, %v684_v16 }
 0x1ee   : > { %v1037_v19 = vpack.c.bf16 %v685_v18, %v683_v17 }
 0x1f0   : > { %1065 = vst [vmem:[%s1245_s29 + $0x60] sm:$0xff] %v1037_v19  }
 0x1f3   : > { %v687_v20 = vpop.f32.mrf.mxu2 }
 0x1f4   : > { %v688_v22 = vadd.f32 %v1234_v37, %v687_v20 }
 0x1fb   : > { %v689_v21 = vpop.f32.mrf.mxu2 }
 0x1fc   : > { %v690_v23 = vadd.f32 %v1234_v37, %v689_v21 }
 0x1fe   : > { %v1042_v24 = vpack.c.bf16 %v690_v23, %v688_v22 }
 0x200   : > { %1066 = vst [vmem:[%s1245_s29 + $0x68] sm:$0xff] %v1042_v24  }
 0x203   : > { %v692_v25 = vpop.f32.mrf.mxu2 }
 0x204   : > { %v693_v28 = vadd.f32 %v1234_v37, %v692_v25 }
 0x20b   : > { %v694_v26 = vpop.f32.mrf.mxu2 }
 0x20c   : > { %v695_v29 = vadd.f32 %v1234_v37, %v694_v26 }
 0x20e   : > { %v1047_v30 = vpack.c.bf16 %v695_v29, %v693_v28 }
 0x210   : > { %1067 = vst [vmem:[%s1245_s29 + $0x70] sm:$0xff] %v1047_v30  }
 0x213   : > { %v697_v31 = vpop.f32.mrf.mxu2 }
 0x214   : > { %v698_v33 = vadd.f32 %v1234_v37, %v697_v31 }
 0x21b   : > { %v699_v32 = vpop.f32.mrf.mxu2 }
 0x21c   : > { %v700_v34 = vadd.f32 %v1234_v37, %v699_v32 }
 0x21e   : > { %v1052_v35 = vpack.c.bf16 %v700_v34, %v698_v33 }
 0x220   : > { %1068 = vst [vmem:[%s1245_s29 + $0x78] sm:$0xff] %v1052_v35  }
 0x221 PF: > { %s15_s18 = sadd.s32 1, %s1095_s18  }
 0x222   : > { %p12_p4 = scmp.ge.s32.totalorder %s15_s18, 4  }
 0x224   :  { %14 = sbr.rel (!%p12_p4) target bundleno = 1 (0x1), region = 70 }

// kernel: unet_forward_nchw.4
= control target key start
LH: loop header
LB: loop body
LE: loop exit
PB: predicated region body
PF: predicated region fallthrough
CT: control target
= control target key end

     0   :  { %s683_s18 = smov 0   ;;  %s750_s0 = inlined_call_operand.vmem [shape: bf16[128,36], index: 0, kind: input, shape index: {}]   ;;  %s751_s1 = inlined_call_operand.vmem [shape: bf16[36,128], index: 1, kind: input, shape index: {}]   ;;  %s752_s2 = inlined_call_operand.vmem [shape: f32[1,128], index: 2, kind: input, shape index: {}]   ;;  %s753_s3 = inlined_call_operand.vmem [shape: bf16[128,128], index: 3, kind: input, shape index: {}]   ;;  %s754_s4 = inlined_call_operand.vmem [shape: f32[1,128], index: 4, kind: input, shape index: {}]   ;;  %s755_s5 = inlined_call_operand.vmem [shape: bf16[128,128], index: 5, kind: output, shape index: {}]  }
   0x1 LB: > { %s508_s19 = sadd.s32 4294967295, %s651_s18   ;;  %p512_p0 = scmp.ge.s32.totalorder %s651_s18, 1  ;;  %s651_s18 = sphi %s683_s18, %s15_s18  }
   0x2   : > { %p188_p1 = scmp.lt.s32.totalorder %s651_s18, 3 }
   0x4   : > { %p189_p2 = pnand %p512_p0, %p188_p1 }
   0x5   : > { %s513_s22 = sshll.u32 (!%p189_p2), %s508_s19, 3 }
   0x6   : > { %192 = sbr.rel (%p189_p2) target bundleno = 351 (0x15f), region = 40  ;;  %p217_p3 = scmp.lt.s32.totalorder (!%p189_p2), %s513_s22, 15 }
   0xb   : > { %v241_v0 = vld [vmem:[%s751_s1 + $0x10] sm:$0x3]  ;;  %vm294_vm0 = vcmask 1041408   ;;  %s757_s22 = smov (!%p217_p3, %s513_s22), 15  ;;  %v584_v4 = vld [vmem:[%s751_s1 + $0x8] sm:$0xff]  ;;  %v583_v5 = vld [vmem:[%s751_s1] sm:$0xff] }
   0xc   : > { %v275_v1 = vunpack.c.l.b16 %v241_v0  ;;  %s514_s25 = sshll.u32 %s757_s22, 2  ;;  %vm281_vm1 = vcmask 293888   ;;  %v592_v8 = vld [vmem:[%s753_s3 + $0x38] sm:$0xff]  ;;  %v591_v9 = vld [vmem:[%s753_s3 + $0x30] sm:$0xff]  ;;  %v590_v10 = vld [vmem:[%s753_s3 + $0x28] sm:$0xff] }
   0xd   : > { %s220_s30 = scalar_lea.vmem %s750_s0, %s514_s25  ;;  %619 = vmatpush.bf16.msra.mxu1 %v592_v8  ;;  %620 = vmatpush.bf16.msra.mxu2 %v592_v8  ;;  %v589_v11 = vld [vmem:[%s753_s3 + $0x20] sm:$0xff]  ;;  %v588_v14 = vld [vmem:[%s753_s3 + $0x18] sm:$0xff]  ;;  %v587_v15 = vld [vmem:[%s753_s3 + $0x10] sm:$0xff]  ;;  %s226_s6 = scalar_lea.vmem %s755_s5, %s514_s25 }
   0xe   : > { %v278_v2 = vpack.c.b16 %v275_v1, %v275_v1  ;;  %v580_v6 = vld [vmem:[%s220_s30 + $0x8] sm:$0xff]  ;;  %v579_v7 = vld [vmem:[%s220_s30] sm:$0xff]  ;;  %v581_v12 = vld [vmem:[%s220_s30 + $0x10] sm:$0xff] }
   0xf   : > { %v582_v13 = vld [vmem:[%s220_s30 + $0x18] sm:$0xff]  ;;  %v586_v16 = vld [vmem:[%s753_s3 + $0x8] sm:$0xff]  ;;  %v585_v17 = vld [vmem:[%s753_s3] sm:$0xff] }
  0x10   : > { %v296_v3 = vsel %vm294_vm0, %v278_v2, 0  ;;  %v643_v19 = vld [vmem:[%s752_s2] ss:$0 sm:$0xff] }
  0x11   : > { %616 = vmatpush.bf16.msra.mxu3 %v296_v3  ;;  %303 = vmatpush.bf16.msra.mxu0 %v296_v3  ;;  %v644_v48 = vld [vmem:[%s754_s4] ss:$0 sm:$0xff] }
  0x12   : > { %621 = vmatpush.bf16.msra.mxu1 %v591_v9  ;;  %622 = vmatpush.bf16.msra.mxu2 %v591_v9 }
  0x15   : > { %617 = vmatpush.bf16.msra.mxu3 %v584_v4  ;;  %304 = vmatpush.bf16.msra.mxu0 %v584_v4 }
  0x16   : > { %623 = vmatpush.bf16.msra.mxu1 %v590_v10  ;;  %624 = vmatpush.bf16.msra.mxu2 %v590_v10 }
  0x19   : > { %618 = vmatpush.bf16.msra.mxu3 %v583_v5  ;;  %305 = vmatpush.bf16.msra.mxu0 %v583_v5 }
  0x1a   : > { %625 = vmatpush.bf16.msra.mxu1 %v589_v11  ;;  %626 = vmatpush.bf16.msra.mxu2 %v589_v11 }
  0x1c   : > { %542 = vmatmul.msk.bf16.vlgmr.msra.gmra.mxu3 %vm281_vm1, %v580_v6  ;;  %541 = vmatmul.msk.bf16.vlgmr.msra.gmra.mxu0 %vm281_vm1, %v579_v7 }
  0x1d   : > { %407 = vmatpush.bf16.msrb.mxu0 %v592_v8 }
  0x1e   : > { %627 = vmatpush.bf16.msra.mxu1 %v588_v14  ;;  %628 = vmatpush.bf16.msra.mxu2 %v588_v14 }
  0x21   : > { %408 = vmatpush.bf16.msrb.mxu0 %v591_v9 }
  0x22   : > { %629 = vmatpush.bf16.msra.mxu1 %v587_v15  ;;  %630 = vmatpush.bf16.msra.mxu2 %v587_v15 }
  0x25   : > { %409 = vmatpush.bf16.msrb.mxu0 %v590_v10 }
  0x26   : > { %631 = vmatpush.bf16.msra.mxu1 %v586_v16  ;;  %632 = vmatpush.bf16.msra.mxu2 %v586_v16 }
  0x29   : > { %410 = vmatpush.bf16.msrb.mxu0 %v589_v11 }
  0x2a   : > { %633 = vmatpush.bf16.msra.mxu1 %v585_v17  ;;  %634 = vmatpush.bf16.msra.mxu2 %v585_v17 }
  0x2c   : > { %543 = vmatmul.msk.bf16.gmra.mxu3 %vm281_vm1, %v581_v12 }
  0x2d   : > { %411 = vmatpush.bf16.msrb.mxu0 %v588_v14 }
  0x31   : > { %412 = vmatpush.bf16.msrb.mxu0 %v587_v15 }
  0x35   : > { %413 = vmatpush.bf16.msrb.mxu0 %v586_v16 }
  0x39   : > { %414 = vmatpush.bf16.msrb.mxu0 %v585_v17 }
  0x3c   : > { %544 = vmatmul.msk.bf16.gmra.mxu3 %vm281_vm1, %v582_v13 }
  0x99   : > { %v307_v18 = vpop.f32.mrf.mxu0 }
  0x9a   : > { %v308_v20 = vadd.f32 %v643_v19, %v307_v18 }
  0x9c   : > { %v327_v23 = vmax.f32 %v308_v20, 0.0 }
  0x9f   : > { %v312_v21 = vpop.f32.mrf.mxu3 }
  0xa0   : > { %v313_v26 = vadd.f32 %v643_v19, %v312_v21 }
  0xa1   : > { %v309_v22 = vpop.f32.mrf.mxu0 }
  0xa2   : > { %v310_v24 = vadd.f32 %v643_v19, %v309_v22  ;;  %v329_v30 = vmax.f32 %v313_v26, 0.0 }
  0xa4   : > { %v328_v25 = vmax.f32 %v310_v24, 0.0 }
  0xa6   : > { %v335_v27 = vpack.c.bf16 %v328_v25, %v327_v23 }
  0xa7   : > { %v314_v28 = vpop.f32.mrf.mxu3 }
  0xa8   : > { %v315_v29 = vadd.f32 %v643_v19, %v314_v28  ;;  %415 = vmatmul.bf16.vlgmr.msrb.gmra.mxu0 %v335_v27 }
  0xaa   : > { %v330_v31 = vmax.f32 %v315_v29, 0.0 }
  0xac   : > { %v336_v32 = vpack.c.bf16 %v330_v31, %v329_v30 }
  0xae   : > { %420 = vmatmul.bf16.vlgmr.msra.gmra.mxu1 %v336_v32 }
  0xaf   : > { %v317_v33 = vpop.f32.mrf.mxu3 }
  0xb0   : > { %v318_v34 = vadd.f32 %v643_v19, %v317_v33 }
  0xb2   : > { %v331_v37 = vmax.f32 %v318_v34, 0.0 }
  0xb7   : > { %v319_v35 = vpop.f32.mrf.mxu3 }
  0xb8   : > { %v320_v36 = vadd.f32 %v643_v19, %v319_v35 }
  0xba   : > { %v332_v38 = vmax.f32 %v320_v36, 0.0 }
  0xbc   : > { %v337_v39 = vpack.c.bf16 %v332_v38, %v331_v37 }
  0xbe   : > { %425 = vmatmul.bf16.vlgmr.msra.gmra.mxu2 %v337_v39 }
  0xbf   : > { %v322_v40 = vpop.f32.mrf.mxu3 }
  0xc0   : > { %v323_v41 = vadd.f32 %v643_v19, %v322_v40 }
  0xc2   : > { %v333_v44 = vmax.f32 %v323_v41, 0.0 }
  0xc7   : > { %v324_v42 = vpop.f32.mrf.mxu3 }
  0xc8   : > { %v325_v43 = vadd.f32 %v643_v19, %v324_v42 }
  0xca   : > { %v334_v45 = vmax.f32 %v325_v43, 0.0 }
  0xcc   : > { %v338_v46 = vpack.c.bf16 %v334_v45, %v333_v44 }
  0xce   : > { %430 = vmatmul.bf16.gmra.mxu2 %v338_v46 }
 0x125   : > { %v416_v47 = vpop.f32.mrf.mxu0 }
 0x126   : > { %v417_v50 = vadd.f32 %v644_v48, %v416_v47 }
 0x12b   : > { %v421_v49 = vpop.f32.mrf.mxu1 }
 0x12c   : > { %v422_v55 = vadd.f32 %v644_v48, %v421_v49 }
 0x12d   : > { %v418_v51 = vpop.f32.mrf.mxu0 }
 0x12e   : > { %v419_v52 = vadd.f32 %v644_v48, %v418_v51 }
 0x130   : > { %v596_v53 = vpack.c.bf16 %v419_v52, %v417_v50 }
 0x132   : > { %597 = vst [vmem:[%s226_s6] sm:$0xff] %v596_v53  }
 0x133   : > { %v423_v54 = vpop.f32.mrf.mxu1 }
 0x134   : > { %v424_v56 = vadd.f32 %v644_v48, %v423_v54 }
 0x136   : > { %v601_v57 = vpack.c.bf16 %v424_v56, %v422_v55 }
 0x138   : > { %613 = vst [vmem:[%s226_s6 + $0x8] sm:$0xff] %v601_v57  }
 0x141   : > { %v426_v58 = vpop.f32.mrf.mxu2 }
 0x142   : > { %v427_v60 = vadd.f32 %v644_v48, %v426_v58 }
 0x149   : > { %v428_v59 = vpop.f32.mrf.mxu2 }
 0x14a   : > { %v429_v61 = vadd.f32 %v644_v48, %v428_v59 }
 0x14c   : > { %v606_v62 = vpack.c.bf16 %v429_v61, %v427_v60 }
 0x14e   : > { %614 = vst [vmem:[%s226_s6 + $0x10] sm:$0xff] %v606_v62  }
 0x151   : > { %v431_v63 = vpop.f32.mrf.mxu2 }
 0x152   : > { %v432_v1 = vadd.f32 %v644_v48, %v431_v63 }
 0x159   : > { %v433_v0 = vpop.f32.mrf.mxu2 }
 0x15a   : > { %v434_v2 = vadd.f32 %v644_v48, %v433_v0 }
 0x15c   : > { %v611_v3 = vpack.c.bf16 %v434_v2, %v432_v1 }
 0x15e   : > { %615 = vst [vmem:[%s226_s6 + $0x18] sm:$0xff] %v611_v3  }
 0x15f PF: > { %s15_s18 = sadd.s32 1, %s651_s18  }
 0x160   : > { %p12_p4 = scmp.ge.s32.totalorder %s15_s18, 4  }
 0x162   :  { %14 = sbr.rel (!%p12_p4) target bundleno = 1 (0x1), region = 70 }

// kernel: unet_forward_nchw.5
= control target key start
LH: loop header
LB: loop body
LE: loop exit
PB: predicated region body
PF: predicated region fallthrough
CT: control target
= control target key end

     0   :  { %s1366_s24 = smov 0   ;;  %s1638_s0 = inlined_call_operand.vmem [shape: bf16[512,108], index: 0, kind: input, shape index: {}]   ;;  %s1639_s1 = inlined_call_operand.vmem [shape: bf16[108,128], index: 1, kind: input, shape index: {}]   ;;  %s1640_s2 = inlined_call_operand.vmem [shape: f32[1,128], index: 2, kind: input, shape index: {}]   ;;  %s1641_s3 = inlined_call_operand.vmem [shape: bf16[128,128], index: 3, kind: input, shape index: {}]   ;;  %s1642_s4 = inlined_call_operand.vmem [shape: f32[1,128], index: 4, kind: input, shape index: {}]   ;;  %s1643_s5 = inlined_call_operand.vmem [shape: bf16[128,128], index: 5, kind: input, shape index: {}]   ;;  %s1644_s6 = inlined_call_operand.vmem [shape: f32[1,128], index: 6, kind: input, shape index: {}]   ;;  %s1645_s7 = inlined_call_operand.vmem [shape: f32[512,128], index: 7, kind: output, shape index: {}]  }
   0x1 LB: > { %s1062_s25 = sadd.s32 4294967295, %s1324_s24   ;;  %p1066_p0 = scmp.ge.s32.totalorder %s1324_s24, 1  ;;  %s1324_s24 = sphi %s1366_s24, %s17_s24  }
   0x2   : > { %p238_p1 = scmp.lt.s32.totalorder %s1324_s24, 3 }
   0x4   : > { %p239_p2 = pnand %p1066_p0, %p238_p1 }
   0x5   : > { %s1067_s11 = sshll.u32 (!%p239_p2), %s1062_s25, 5 }
   0x6   : > { %242 = sbr.rel (%p239_p2) target bundleno = 709 (0x2c5), region = 48  ;;  %p271_p3 = scmp.lt.s32.totalorder (!%p239_p2), %s1067_s11, 63 }
   0xb   : > { %v1161_v0 = vld [vmem:[%s1639_s1 + $0x30] sm:$0xf]  ;;  %v1267_v1 = vld [vmem:[%s1639_s1 + $0x30] sm:$0x30]  ;;  %vm503_vm0 = vcmask 1045504   ;;  %v1266_v4 = vld [vmem:[%s1639_s1 + $0x28] sm:$0xff] }
   0xc   : > { %v1162_v2 = vor.u32 %v1267_v1, %v1161_v0  ;;  %v1265_v5 = vld [vmem:[%s1639_s1 + $0x20] sm:$0xff]  ;;  %v1264_v6 = vld [vmem:[%s1639_s1 + $0x18] sm:$0xff]  ;;  %v1263_v7 = vld [vmem:[%s1639_s1 + $0x10] sm:$0xff]  ;;  %s1647_s11 = smov (!%p271_p3, %s1067_s11), 63  ;;  %vm454_vm1 = vcmask 883712  }
   0xd   : > { %v1262_v8 = vld [vmem:[%s1639_s1 + $0x8] sm:$0xff]  ;;  %s1068_s18 = sshll.u32 %s1647_s11, 2  ;;  %v1261_v9 = vld [vmem:[%s1639_s1] sm:$0xff]  ;;  %v1275_v15 = vld [vmem:[%s1641_s3 + $0x38] sm:$0xff] }
   0xe   : > { %v505_v3 = vsel %vm503_vm0, %v1162_v2, 0  ;;  %s1404_s23 = scalar_lea.vmem %s1638_s0, %s1068_s18  ;;  %712 = vmatpush.bf16.msra.mxu1 %v1275_v15  ;;  %v1274_v17 = vld [vmem:[%s1641_s3 + $0x30] sm:$0xff]  ;;  %v1273_v18 = vld [vmem:[%s1641_s3 + $0x28] sm:$0xff]  ;;  %v1272_v19 = vld [vmem:[%s1641_s3 + $0x20] sm:$0xff]  ;;  %s1070_s18 = sshll.u32 %s1647_s11, 3 }
   0xf   : > { %508 = vmatpush.bf16.msra.mxu0 %v505_v3  ;;  %1284 = vmatpush.bf16.msra.mxu3 %v505_v3  ;;  %v1245_v10 = vld [vmem:[%s1404_s23] sm:$0xff]  ;;  %v1246_v11 = vld [vmem:[%s1404_s23 + $0x8] sm:$0xff]  ;;  %v1247_v12 = vld [vmem:[%s1404_s23 + $0x10] sm:$0xff] }
  0x10   : > { %v1248_v13 = vld [vmem:[%s1404_s23 + $0x18] sm:$0xff]  ;;  %v1249_v14 = vld [vmem:[%s1404_s23 + $0x20] sm:$0xff]  ;;  %v1250_v16 = vld [vmem:[%s1404_s23 + $0x28] sm:$0xff] }
  0x11   : > { %v1271_v20 = vld [vmem:[%s1641_s3 + $0x18] sm:$0xff]  ;;  %v1251_v21 = vld [vmem:[%s1404_s23 + $0x30] sm:$0xff]  ;;  %v1269_v23 = vld [vmem:[%s1641_s3 + $0x8] sm:$0xff] }
  0x12   : > { %713 = vmatpush.bf16.msra.mxu1 %v1274_v17  ;;  %v1270_v22 = vld [vmem:[%s1641_s3 + $0x10] sm:$0xff]  ;;  %v1268_v24 = vld [vmem:[%s1641_s3] sm:$0xff]  ;;  %v1252_v25 = vld [vmem:[%s1404_s23 + $0x38] sm:$0xff] }
  0x13   : > { %509 = vmatpush.bf16.msra.mxu0 %v1266_v4  ;;  %1285 = vmatpush.bf16.msra.mxu3 %v1266_v4  ;;  %v1253_v26 = vld [vmem:[%s1404_s23 + $0x40] sm:$0xff]  ;;  %v1254_v35 = vld [vmem:[%s1404_s23 + $0x48] sm:$0xff]  ;;  %v1255_v43 = vld [vmem:[%s1404_s23 + $0x50] sm:$0xff] }
  0x14   : > { %v1450_v28 = vld [vmem:[%s1640_s2] ss:$0 sm:$0xff]  ;;  %v1258_v45 = vld [vmem:[%s1404_s23 + $0x68] sm:$0xff]  ;;  %v1256_v52 = vld [vmem:[%s1404_s23 + $0x58] sm:$0xff] }
  0x15   : > { %v1259_v54 = vld [vmem:[%s1404_s23 + $0x70] sm:$0xff]  ;;  %v1257_v61 = vld [vmem:[%s1404_s23 + $0x60] sm:$0xff]  ;;  %v1260_v63 = vld [vmem:[%s1404_s23 + $0x78] sm:$0xff]  ;;  %s1555_s23 = scalar_lea.vmem %s1645_s7, %s1070_s18 }
  0x16   : > { %714 = vmatpush.bf16.msra.mxu1 %v1273_v18 }
  0x17   : > { %510 = vmatpush.bf16.msra.mxu0 %v1265_v5  ;;  %1286 = vmatpush.bf16.msra.mxu3 %v1265_v5 }
  0x1a   : > { %715 = vmatpush.bf16.msra.mxu1 %v1272_v19 }
  0x1b   : > { %511 = vmatpush.bf16.msra.mxu0 %v1264_v6  ;;  %1287 = vmatpush.bf16.msra.mxu3 %v1264_v6 }
  0x1e   : > { %716 = vmatpush.bf16.msra.mxu1 %v1271_v20 }
  0x1f   : > { %512 = vmatpush.bf16.msra.mxu0 %v1263_v7  ;;  %1288 = vmatpush.bf16.msra.mxu3 %v1263_v7 }
  0x22   : > { %717 = vmatpush.bf16.msra.mxu1 %v1270_v22 }
  0x23   : > { %513 = vmatpush.bf16.msra.mxu0 %v1262_v8  ;;  %1289 = vmatpush.bf16.msra.mxu3 %v1262_v8 }
  0x26   : > { %718 = vmatpush.bf16.msra.mxu1 %v1269_v23 }
  0x27   : > { %514 = vmatpush.bf16.msra.mxu0 %v1261_v9  ;;  %1290 = vmatpush.bf16.msra.mxu3 %v1261_v9  ;;  %v1283_v9 = vld [vmem:[%s1643_s5 + $0x38] sm:$0xff] }
  0x28   : > { %885 = vmatpush.bf16.msra.mxu2 %v1283_v9 }
  0x2a   : > { %1163 = vmatmul.msk.bf16.vlgmr.msra.gmra.mxu0 %vm454_vm1, %v1245_v10  ;;  %719 = vmatpush.bf16.msra.mxu1 %v1268_v24 }
  0x2b   : > { %1291 = vmatpush.bf16.msrb.mxu3 %v1275_v15 }
  0x2c   : > { %1176 = vmatmul.msk.bf16.vlgmr.msra.gmra.mxu3 %vm454_vm1, %v1258_v45  ;;  %v1512_v45 = vld [vmem:[%s1642_s4] ss:$0 sm:$0xff] }
  0x2f   : > { %1292 = vmatpush.bf16.msrb.mxu3 %v1274_v17  ;;  %v1280_v17 = vld [vmem:[%s1643_s5 + $0x20] sm:$0xff] }
  0x33   : > { %1293 = vmatpush.bf16.msrb.mxu3 %v1273_v18 }
  0x37   : > { %1294 = vmatpush.bf16.msrb.mxu3 %v1272_v19 }
  0x3a   : > { %1164 = vmatmul.msk.bf16.gmra.mxu0 %vm454_vm1, %v1246_v11 }
  0x3b   : > { %1295 = vmatpush.bf16.msrb.mxu3 %v1271_v20  ;;  %v1279_v20 = vld [vmem:[%s1643_s5 + $0x18] sm:$0xff] }
  0x3c   : > { %1177 = vmatmul.msk.bf16.gmra.mxu3 %vm454_vm1, %v1259_v54 }
  0x3f   : > { %1296 = vmatpush.bf16.msrb.mxu3 %v1270_v22 }
  0x43   : > { %1297 = vmatpush.bf16.msrb.mxu3 %v1269_v23 }
  0x47   : > { %1298 = vmatpush.bf16.msrb.mxu3 %v1268_v24  ;;  %v1278_v24 = vld [vmem:[%s1643_s5 + $0x10] sm:$0xff] }
  0x4a   : > { %1165 = vmatmul.msk.bf16.gmra.mxu0 %vm454_vm1, %v1247_v12 }
  0x4b   : > { %1299 = vmatpush.bf16.msra.mxu3 %v1283_v9 }
  0x4c   : > { %1178 = vmatmul.msk.bf16.gmra.mxu3 %vm454_vm1, %v1260_v63 }
  0x5a   : > { %1166 = vmatmul.msk.bf16.gmra.mxu0 %vm454_vm1, %v1248_v13  ;;  %v1282_v13 = vld [vmem:[%s1643_s5 + $0x30] sm:$0xff] }
  0x5b   : > { %886 = vmatpush.bf16.msra.mxu2 %v1282_v13  ;;  %1300 = vmatpush.bf16.msra.mxu3 %v1282_v13 }
  0x6a   : > { %1167 = vmatmul.msk.bf16.gmra.mxu0 %vm454_vm1, %v1249_v14 }
  0x7a   : > { %1168 = vmatmul.msk.bf16.gmra.mxu0 %vm454_vm1, %v1250_v16  ;;  %v1281_v16 = vld [vmem:[%s1643_s5 + $0x28] sm:$0xff] }
  0x7b   : > { %887 = vmatpush.bf16.msra.mxu2 %v1281_v16  ;;  %1301 = vmatpush.bf16.msra.mxu3 %v1281_v16 }
  0x7f   : > { %888 = vmatpush.bf16.msra.mxu2 %v1280_v17  ;;  %1302 = vmatpush.bf16.msra.mxu3 %v1280_v17 }
  0x83   : > { %889 = vmatpush.bf16.msra.mxu2 %v1279_v20  ;;  %1303 = vmatpush.bf16.msra.mxu3 %v1279_v20 }
  0x87   : > { %890 = vmatpush.bf16.msra.mxu2 %v1278_v24  ;;  %1304 = vmatpush.bf16.msra.mxu3 %v1278_v24 }
  0x8a   : > { %1169 = vmatmul.msk.bf16.gmra.mxu0 %vm454_vm1, %v1251_v21 }
  0x9a   : > { %1170 = vmatmul.msk.bf16.gmra.mxu0 %vm454_vm1, %v1252_v25 }
  0xa7   : > { %v516_v27 = vpop.f32.mrf.mxu0 }
  0xa8   : > { %v517_v29 = vadd.f32 %v1450_v28, %v516_v27  ;;  %v1277_v27 = vld [vmem:[%s1643_s5 + $0x8] sm:$0xff] }
  0xa9   : > { %891 = vmatpush.bf16.msra.mxu2 %v1277_v27  ;;  %1305 = vmatpush.bf16.msra.mxu3 %v1277_v27 }
  0xaa   : > { %1171 = vmatmul.msk.bf16.gmra.mxu0 %vm454_vm1, %v1253_v26  ;;  %v596_v32 = vmax.f32 %v517_v29, 0.0  ;;  %v1276_v29 = vld [vmem:[%s1643_s5] sm:$0xff] }
  0xad   : > { %892 = vmatpush.bf16.msra.mxu2 %v1276_v29  ;;  %1306 = vmatpush.bf16.msra.mxu3 %v1276_v29 }
  0xaf   : > { %v518_v30 = vpop.f32.mrf.mxu0 }
  0xb0   : > { %v519_v31 = vadd.f32 %v1450_v28, %v518_v30 }
  0xb2   : > { %v597_v33 = vmax.f32 %v519_v31, 0.0 }
  0xb4   : > { %v628_v34 = vpack.c.bf16 %v597_v33, %v596_v32 }
  0xb6   : > { %720 = vmatmul.bf16.vlgmr.msra.gmra.mxu1 %v628_v34 }
  0xb7   : > { %v521_v36 = vpop.f32.mrf.mxu0 }
  0xb8   : > { %v522_v37 = vadd.f32 %v1450_v28, %v521_v36 }
  0xba   : > { %1172 = vmatmul.msk.bf16.gmra.mxu0 %vm454_vm1, %v1254_v35  ;;  %v598_v40 = vmax.f32 %v522_v37, 0.0 }
  0xbf   : > { %v523_v38 = vpop.f32.mrf.mxu0 }
  0xc0   : > { %v524_v39 = vadd.f32 %v1450_v28, %v523_v38 }
  0xc2   : > { %v599_v41 = vmax.f32 %v524_v39, 0.0 }
  0xc4   : > { %v629_v42 = vpack.c.bf16 %v599_v41, %v598_v40 }
  0xc6   : > { %725 = vmatmul.bf16.gmra.mxu1 %v629_v42 }
  0xc7   : > { %v526_v44 = vpop.f32.mrf.mxu0 }
  0xc8   : > { %v527_v46 = vadd.f32 %v1450_v28, %v526_v44 }
  0xca   : > { %1173 = vmatmul.msk.bf16.gmra.mxu0 %vm454_vm1, %v1255_v43  ;;  %v600_v49 = vmax.f32 %v527_v46, 0.0 }
  0xcf   : > { %v528_v47 = vpop.f32.mrf.mxu0 }
  0xd0   : > { %v529_v48 = vadd.f32 %v1450_v28, %v528_v47 }
  0xd2   : > { %v601_v50 = vmax.f32 %v529_v48, 0.0 }
  0xd4   : > { %v630_v51 = vpack.c.bf16 %v601_v50, %v600_v49 }
  0xd6   : > { %730 = vmatmul.bf16.gmra.mxu1 %v630_v51 }
  0xd7   : > { %v531_v53 = vpop.f32.mrf.mxu0 }
  0xd8   : > { %v532_v55 = vadd.f32 %v1450_v28, %v531_v53 }
  0xda   : > { %1174 = vmatmul.msk.bf16.gmra.mxu0 %vm454_vm1, %v1256_v52  ;;  %v602_v58 = vmax.f32 %v532_v55, 0.0 }
  0xdf   : > { %v533_v56 = vpop.f32.mrf.mxu0 }
  0xe0   : > { %v534_v57 = vadd.f32 %v1450_v28, %v533_v56 }
  0xe2   : > { %v603_v59 = vmax.f32 %v534_v57, 0.0 }
  0xe4   : > { %v631_v60 = vpack.c.bf16 %v603_v59, %v602_v58 }
  0xe6   : > { %735 = vmatmul.bf16.gmra.mxu1 %v631_v60 }
  0xe7   : > { %v536_v62 = vpop.f32.mrf.mxu0 }
  0xe8   : > { %v537_v0 = vadd.f32 %v1450_v28, %v536_v62 }
  0xea   : > { %1175 = vmatmul.msk.bf16.gmra.mxu0 %vm454_vm1, %v1257_v61  ;;  %v604_v3 = vmax.f32 %v537_v0, 0.0 }
  0xef   : > { %v538_v1 = vpop.f32.mrf.mxu0 }
  0xf0   : > { %v539_v2 = vadd.f32 %v1450_v28, %v538_v1 }
  0xf2   : > { %v605_v4 = vmax.f32 %v539_v2, 0.0 }
  0xf4   : > { %v632_v5 = vpack.c.bf16 %v605_v4, %v604_v3 }
  0xf6   : > { %740 = vmatmul.bf16.gmra.mxu1 %v632_v5 }
  0xf7   : > { %v541_v6 = vpop.f32.mrf.mxu0 }
  0xf8   : > { %v542_v7 = vadd.f32 %v1450_v28, %v541_v6 }
  0xfa   : > { %v606_v11 = vmax.f32 %v542_v7, 0.0 }
  0xff   : > { %v543_v8 = vpop.f32.mrf.mxu0 }
 0x100   : > { %v544_v10 = vadd.f32 %v1450_v28, %v543_v8 }
 0x102   : > { %v607_v12 = vmax.f32 %v544_v10, 0.0 }
 0x104   : > { %v633_v14 = vpack.c.bf16 %v607_v12, %v606_v11 }
 0x106   : > { %745 = vmatmul.bf16.gmra.mxu1 %v633_v14 }
 0x107   : > { %v546_v15 = vpop.f32.mrf.mxu0 }
 0x108   : > { %v547_v18 = vadd.f32 %v1450_v28, %v546_v15 }
 0x10a   : > { %v608_v22 = vmax.f32 %v547_v18, 0.0  ;;  %v581_v18 = vpop.f32.mrf.mxu3 }
 0x10f   : > { %v548_v19 = vpop.f32.mrf.mxu0 }
 0x110   : > { %v549_v21 = vadd.f32 %v1450_v28, %v548_v19 }
 0x112   : > { %v609_v23 = vmax.f32 %v549_v21, 0.0 }
 0x114   : > { %v634_v25 = vpack.c.bf16 %v609_v23, %v608_v22 }
 0x116   : > { %750 = vmatmul.bf16.gmra.mxu1 %v634_v25 }
 0x117   : > { %v551_v26 = vpop.f32.mrf.mxu0 }
 0x118   : > { %v552_v30 = vadd.f32 %v1450_v28, %v551_v26  ;;  %v583_v26 = vpop.f32.mrf.mxu3 }
 0x11a   : > { %v610_v33 = vmax.f32 %v552_v30, 0.0 }
 0x11f   : > { %v553_v31 = vpop.f32.mrf.mxu0 }
 0x120   : > { %v554_v32 = vadd.f32 %v1450_v28, %v553_v31 }
 0x122   : > { %v611_v34 = vmax.f32 %v554_v32, 0.0 }
 0x124   : > { %v635_v35 = vpack.c.bf16 %v611_v34, %v610_v33  ;;  %v586_v33 = vpop.f32.mrf.mxu3  ;;  %v582_v34 = vadd.f32 %v1450_v28, %v581_v18 }
 0x126   : > { %755 = vmatmul.bf16.gmra.mxu1 %v635_v35 }
 0x127   : > { %v556_v36 = vpop.f32.mrf.mxu0 }
 0x128   : > { %v557_v37 = vadd.f32 %v1450_v28, %v556_v36  ;;  %v584_v36 = vadd.f32 %v1450_v28, %v583_v26 }
 0x12a   : > { %v612_v40 = vmax.f32 %v557_v37, 0.0 }
 0x12f   : > { %v558_v38 = vpop.f32.mrf.mxu0 }
 0x130   : > { %v559_v39 = vadd.f32 %v1450_v28, %v558_v38 }
 0x132   : > { %v613_v41 = vmax.f32 %v559_v39, 0.0  ;;  %v622_v39 = vmax.f32 %v582_v34, 0.0 }
 0x133   : > { %v721_v42 = vpop.f32.mrf.mxu1 }
 0x134   : > { %v636_v43 = vpack.c.bf16 %v613_v41, %v612_v40  ;;  %v722_v47 = vadd.f32 %v1512_v45, %v721_v42  ;;  %v623_v40 = vmax.f32 %v584_v36, 0.0 }
 0x136   : > { %760 = vmatmul.bf16.gmra.mxu1 %v636_v43  ;;  %v641_v42 = vpack.c.bf16 %v623_v40, %v622_v39  ;;  %v588_v43 = vpop.f32.mrf.mxu3 }
 0x137   : > { %v561_v44 = vpop.f32.mrf.mxu0 }
 0x138   : > { %v562_v49 = vadd.f32 %v1450_v28, %v561_v44 }
 0x13a   : > { %v614_v53 = vmax.f32 %v562_v49, 0.0 }
 0x13b   : > { %v723_v46 = vpop.f32.mrf.mxu1 }
 0x13c   : > { %v724_v48 = vadd.f32 %v1512_v45, %v723_v46  ;;  %v587_v46 = vadd.f32 %v1450_v28, %v586_v33 }
 0x13e   : > { %v801_v50 = vpack.c.bf16 %v724_v48, %v722_v47  ;;  %v589_v48 = vadd.f32 %v1450_v28, %v588_v43 }
 0x13f   : > { %v563_v51 = vpop.f32.mrf.mxu0 }
 0x140   : > { %v564_v52 = vadd.f32 %v1450_v28, %v563_v51  ;;  %893 = vmatmul.bf16.vlgmr.msra.gmra.mxu2 %v801_v50  ;;  %v591_v51 = vpop.f32.mrf.mxu3 }
 0x142   : > { %v615_v54 = vmax.f32 %v564_v52, 0.0  ;;  %v624_v52 = vmax.f32 %v587_v46, 0.0 }
 0x143   : > { %v726_v55 = vpop.f32.mrf.mxu1 }
 0x144   : > { %v637_v56 = vpack.c.bf16 %v615_v54, %v614_v53  ;;  %v727_v59 = vadd.f32 %v1512_v45, %v726_v55  ;;  %v625_v53 = vmax.f32 %v589_v48, 0.0 }
 0x146   : > { %765 = vmatmul.bf16.gmra.mxu1 %v637_v56  ;;  %v642_v55 = vpack.c.bf16 %v625_v53, %v624_v52 }
 0x147   : > { %v566_v57 = vpop.f32.mrf.mxu0 }
 0x148   : > { %v567_v61 = vadd.f32 %v1450_v28, %v566_v57  ;;  %v593_v56 = vpop.f32.mrf.mxu3 }
 0x14a   : > { %v616_v1 = vmax.f32 %v567_v61, 0.0 }
 0x14b   : > { %v728_v58 = vpop.f32.mrf.mxu1 }
 0x14c   : > { %v729_v60 = vadd.f32 %v1512_v45, %v728_v58  ;;  %v592_v58 = vadd.f32 %v1450_v28, %v591_v51 }
 0x14e   : > { %v802_v62 = vpack.c.bf16 %v729_v60, %v727_v59  ;;  %v594_v60 = vadd.f32 %v1450_v28, %v593_v56 }
 0x14f   : > { %v568_v63 = vpop.f32.mrf.mxu0 }
 0x150   : > { %v569_v0 = vadd.f32 %v1450_v28, %v568_v63  ;;  %898 = vmatmul.bf16.gmra.mxu2 %v802_v62  ;;  %v626_v63 = vmax.f32 %v592_v58, 0.0 }
 0x152   : > { %v617_v2 = vmax.f32 %v569_v0, 0.0  ;;  %v627_v0 = vmax.f32 %v594_v60, 0.0 }
 0x153   : > { %v731_v3 = vpop.f32.mrf.mxu1 }
 0x154   : > { %v638_v4 = vpack.c.bf16 %v617_v2, %v616_v1  ;;  %v732_v7 = vadd.f32 %v1512_v45, %v731_v3  ;;  %v643_v2 = vpack.c.bf16 %v627_v0, %v626_v63 }
 0x156   : > { %770 = vmatmul.bf16.gmra.mxu1 %v638_v4 }
 0x157   : > { %v571_v5 = vpop.f32.mrf.mxu0 }
 0x158   : > { %v572_v9 = vadd.f32 %v1450_v28, %v571_v5 }
 0x15a   : > { %v618_v13 = vmax.f32 %v572_v9, 0.0 }
 0x15b   : > { %v733_v6 = vpop.f32.mrf.mxu1 }
 0x15c   : > { %v734_v8 = vadd.f32 %v1512_v45, %v733_v6 }
 0x15e   : > { %v803_v10 = vpack.c.bf16 %v734_v8, %v732_v7 }
 0x15f   : > { %v573_v11 = vpop.f32.mrf.mxu0 }
 0x160   : > { %v574_v12 = vadd.f32 %v1450_v28, %v573_v11  ;;  %903 = vmatmul.bf16.gmra.mxu2 %v803_v10  ;;  %v1550_v11 = vld [vmem:[%s1644_s6] ss:$0 sm:$0xff] }
 0x162   : > { %v619_v14 = vmax.f32 %v574_v12, 0.0 }
 0x163   : > { %v736_v15 = vpop.f32.mrf.mxu1 }
 0x164   : > { %v639_v16 = vpack.c.bf16 %v619_v14, %v618_v13  ;;  %v737_v20 = vadd.f32 %v1512_v45, %v736_v15 }
 0x166   : > { %775 = vmatmul.bf16.gmra.mxu1 %v639_v16 }
 0x167   : > { %v576_v17 = vpop.f32.mrf.mxu0 }
 0x168   : > { %v577_v22 = vadd.f32 %v1450_v28, %v576_v17 }
 0x16a   : > { %v620_v27 = vmax.f32 %v577_v22, 0.0 }
 0x16b   : > { %v738_v19 = vpop.f32.mrf.mxu1 }
 0x16c   : > { %v739_v21 = vadd.f32 %v1512_v45, %v738_v19 }
 0x16e   : > { %v804_v23 = vpack.c.bf16 %v739_v21, %v737_v20 }
 0x16f   : > { %v578_v24 = vpop.f32.mrf.mxu0 }
 0x170   : > { %v579_v25 = vadd.f32 %v1450_v28, %v578_v24  ;;  %908 = vmatmul.bf16.gmra.mxu2 %v804_v23 }
 0x172   : > { %v621_v29 = vmax.f32 %v579_v25, 0.0 }
 0x173   : > { %v741_v30 = vpop.f32.mrf.mxu1 }
 0x174   : > { %v640_v31 = vpack.c.bf16 %v621_v29, %v620_v27  ;;  %v742_v35 = vadd.f32 %v1512_v45, %v741_v30 }
 0x176   : > { %780 = vmatmul.bf16.vlgmr.msrb.gmra.mxu3 %v640_v31 }
 0x17b   : > { %v743_v32 = vpop.f32.mrf.mxu1 }
 0x17c   : > { %v744_v37 = vadd.f32 %v1512_v45, %v743_v32 }
 0x17e   : > { %v805_v38 = vpack.c.bf16 %v744_v37, %v742_v35 }
 0x180   : > { %913 = vmatmul.bf16.gmra.mxu2 %v805_v38 }
 0x183   : > { %v746_v41 = vpop.f32.mrf.mxu1 }
 0x184   : > { %v747_v47 = vadd.f32 %v1512_v45, %v746_v41 }
 0x186   : > { %785 = vmatmul.bf16.gmra.mxu3 %v641_v42 }
 0x18b   : > { %v748_v44 = vpop.f32.mrf.mxu1 }
 0x18c   : > { %v749_v49 = vadd.f32 %v1512_v45, %v748_v44 }
 0x18e   : > { %v806_v50 = vpack.c.bf16 %v749_v49, %v747_v47 }
 0x190   : > { %918 = vmatmul.bf16.gmra.mxu2 %v806_v50 }
 0x193   : > { %v751_v54 = vpop.f32.mrf.mxu1 }
 0x194   : > { %v752_v59 = vadd.f32 %v1512_v45, %v751_v54 }
 0x196   : > { %790 = vmatmul.bf16.gmra.mxu3 %v642_v55 }
 0x19b   : > { %v753_v57 = vpop.f32.mrf.mxu1 }
 0x19c   : > { %v754_v61 = vadd.f32 %v1512_v45, %v753_v57 }
 0x19e   : > { %v807_v62 = vpack.c.bf16 %v754_v61, %v752_v59 }
 0x1a0   : > { %923 = vmatmul.bf16.gmra.mxu2 %v807_v62 }
 0x1a3   : > { %v756_v1 = vpop.f32.mrf.mxu1 }
 0x1a4   : > { %v757_v4 = vadd.f32 %v1512_v45, %v756_v1 }
 0x1a6   : > { %795 = vmatmul.bf16.gmra.mxu3 %v643_v2 }
 0x1ab   : > { %v758_v3 = vpop.f32.mrf.mxu1 }
 0x1ac   : > { %v759_v5 = vadd.f32 %v1512_v45, %v758_v3 }
 0x1ae   : > { %v808_v6 = vpack.c.bf16 %v759_v5, %v757_v4 }
 0x1b0   : > { %928 = vmatmul.bf16.gmra.mxu2 %v808_v6 }
 0x1b3   : > { %v761_v7 = vpop.f32.mrf.mxu1 }
 0x1b4   : > { %v762_v28 = vadd.f32 %v1512_v45, %v761_v7 }
 0x1bb   : > { %v763_v8 = vpop.f32.mrf.mxu1 }
 0x1bc   : > { %v764_v9 = vadd.f32 %v1512_v45, %v763_v8 }
 0x1be   : > { %v809_v10 = vpack.c.bf16 %v764_v9, %v762_v28 }
 0x1c0   : > { %933 = vmatmul.bf16.gmra.mxu2 %v809_v10 }
 0x1c3   : > { %v766_v12 = vpop.f32.mrf.mxu1  ;;  %v894_v13 = vpop.f32.mrf.mxu2 }
 0x1c4   : > { %v895_v14 = vadd.f32 %v1550_v11, %v894_v13  ;;  %v767_v17 = vadd.f32 %v1512_v45, %v766_v12 }
 0x1c6   : > { %974 = vst [vmem:[%s1555_s23] sm:$0xff] %v895_v14 }
 0x1cb   : > { %v768_v15 = vpop.f32.mrf.mxu1  ;;  %v896_v16 = vpop.f32.mrf.mxu2 }
 0x1cc   : > { %v769_v18 = vadd.f32 %v1512_v45, %v768_v15  ;;  %v897_v19 = vadd.f32 %v1550_v11, %v896_v16 }
 0x1ce   : > { %975 = vst [vmem:[%s1555_s23 + $0x8] sm:$0xff] %v897_v19  ;;  %v810_v20 = vpack.c.bf16 %v769_v18, %v767_v17 }
 0x1d0   : > { %938 = vmatmul.bf16.gmra.mxu2 %v810_v20 }
 0x1d3   : > { %v771_v21 = vpop.f32.mrf.mxu1  ;;  %v899_v22 = vpop.f32.mrf.mxu2 }
 0x1d4   : > { %v900_v23 = vadd.f32 %v1550_v11, %v899_v22  ;;  %v772_v26 = vadd.f32 %v1512_v45, %v771_v21 }
 0x1d6   : > { %976 = vst [vmem:[%s1555_s23 + $0x10] sm:$0xff] %v900_v23 }
 0x1db   : > { %v773_v24 = vpop.f32.mrf.mxu1  ;;  %v901_v25 = vpop.f32.mrf.mxu2 }
 0x1dc   : > { %v774_v27 = vadd.f32 %v1512_v45, %v773_v24  ;;  %v902_v29 = vadd.f32 %v1550_v11, %v901_v25 }
 0x1de   : > { %977 = vst [vmem:[%s1555_s23 + $0x18] sm:$0xff] %v902_v29  ;;  %v811_v30 = vpack.c.bf16 %v774_v27, %v772_v26 }
 0x1e0   : > { %943 = vmatmul.bf16.gmra.mxu2 %v811_v30 }
 0x1e3   : > { %v776_v31 = vpop.f32.mrf.mxu1  ;;  %v904_v32 = vpop.f32.mrf.mxu2 }
 0x1e4   : > { %v905_v33 = vadd.f32 %v1550_v11, %v904_v32  ;;  %v777_v36 = vadd.f32 %v1512_v45, %v776_v31 }
 0x1e6   : > { %978 = vst [vmem:[%s1555_s23 + $0x20] sm:$0xff] %v905_v33 }
 0x1eb   : > { %v778_v34 = vpop.f32.mrf.mxu1  ;;  %v906_v35 = vpop.f32.mrf.mxu2 }
 0x1ec   : > { %v779_v37 = vadd.f32 %v1512_v45, %v778_v34  ;;  %v907_v38 = vadd.f32 %v1550_v11, %v906_v35 }
 0x1ee   : > { %979 = vst [vmem:[%s1555_s23 + $0x28] sm:$0xff] %v907_v38  ;;  %v812_v39 = vpack.c.bf16 %v779_v37, %v777_v36 }
 0x1f0   : > { %948 = vmatmul.bf16.gmra.mxu2 %v812_v39 }
 0x1f3   : > { %v909_v40 = vpop.f32.mrf.mxu2 }
 0x1f4   : > { %v910_v41 = vadd.f32 %v1550_v11, %v909_v40 }
 0x1f6   : > { %980 = vst [vmem:[%s1555_s23 + $0x30] sm:$0xff] %v910_v41 }
 0x1f9   : > { %v781_v42 = vpop.f32.mrf.mxu3 }
 0x1fa   : > { %v782_v47 = vadd.f32 %v1512_v45, %v781_v42 }
 0x1fb   : > { %v911_v43 = vpop.f32.mrf.mxu2 }
 0x1fc   : > { %v912_v44 = vadd.f32 %v1550_v11, %v911_v43 }
 0x1fe   : > { %981 = vst [vmem:[%s1555_s23 + $0x38] sm:$0xff] %v912_v44 }
 0x201   : > { %v783_v46 = vpop.f32.mrf.mxu3 }
 0x202   : > { %v784_v48 = vadd.f32 %v1512_v45, %v783_v46 }
 0x203   : > { %v914_v49 = vpop.f32.mrf.mxu2 }
 0x204   : > { %v813_v50 = vpack.c.bf16 %v784_v48, %v782_v47  ;;  %v915_v51 = vadd.f32 %v1550_v11, %v914_v49 }
 0x206   : > { %982 = vst [vmem:[%s1555_s23 + $0x40] sm:$0xff] %v915_v51  ;;  %953 = vmatmul.bf16.vlgmr.msra.gmra.mxu3 %v813_v50 }
 0x209   : > { %v786_v52 = vpop.f32.mrf.mxu3 }
 0x20a   : > { %v787_v56 = vadd.f32 %v1512_v45, %v786_v52 }
 0x20b   : > { %v916_v53 = vpop.f32.mrf.mxu2 }
 0x20c   : > { %v917_v54 = vadd.f32 %v1550_v11, %v916_v53 }
 0x20e   : > { %983 = vst [vmem:[%s1555_s23 + $0x48] sm:$0xff] %v917_v54 }
 0x211   : > { %v788_v55 = vpop.f32.mrf.mxu3 }
 0x212   : > { %v789_v57 = vadd.f32 %v1512_v45, %v788_v55 }
 0x213   : > { %v919_v58 = vpop.f32.mrf.mxu2 }
 0x214   : > { %v920_v59 = vadd.f32 %v1550_v11, %v919_v58  ;;  %v814_v60 = vpack.c.bf16 %v789_v57, %v787_v56 }
 0x216   : > { %984 = vst [vmem:[%s1555_s23 + $0x50] sm:$0xff] %v920_v59  ;;  %958 = vmatmul.bf16.gmra.mxu3 %v814_v60 }
 0x219   : > { %v791_v61 = vpop.f32.mrf.mxu3 }
 0x21a   : > { %v792_v1 = vadd.f32 %v1512_v45, %v791_v61 }
 0x21b   : > { %v921_v62 = vpop.f32.mrf.mxu2 }
 0x21c   : > { %v922_v63 = vadd.f32 %v1550_v11, %v921_v62 }
 0x21e   : > { %985 = vst [vmem:[%s1555_s23 + $0x58] sm:$0xff] %v922_v63 }
 0x221   : > { %v793_v0 = vpop.f32.mrf.mxu3 }
 0x222   : > { %v794_v2 = vadd.f32 %v1512_v45, %v793_v0 }
 0x223   : > { %v924_v3 = vpop.f32.mrf.mxu2 }
 0x224   : > { %v925_v4 = vadd.f32 %v1550_v11, %v924_v3  ;;  %v815_v5 = vpack.c.bf16 %v794_v2, %v792_v1 }
 0x226   : > { %986 = vst [vmem:[%s1555_s23 + $0x60] sm:$0xff] %v925_v4  ;;  %963 = vmatmul.bf16.gmra.mxu3 %v815_v5 }
 0x229   : > { %v796_v6 = vpop.f32.mrf.mxu3 }
 0x22a   : > { %v797_v9 = vadd.f32 %v1512_v45, %v796_v6 }
 0x22b   : > { %v926_v7 = vpop.f32.mrf.mxu2 }
 0x22c   : > { %v927_v8 = vadd.f32 %v1550_v11, %v926_v7 }
 0x22e   : > { %987 = vst [vmem:[%s1555_s23 + $0x68] sm:$0xff] %v927_v8 }
 0x231   : > { %v798_v28 = vpop.f32.mrf.mxu3 }
 0x232   : > { %v799_v10 = vadd.f32 %v1512_v45, %v798_v28 }
 0x233   : > { %v929_v12 = vpop.f32.mrf.mxu2 }
 0x234   : > { %v930_v13 = vadd.f32 %v1550_v11, %v929_v12  ;;  %v816_v14 = vpack.c.bf16 %v799_v10, %v797_v9 }
 0x236   : > { %988 = vst [vmem:[%s1555_s23 + $0x70] sm:$0xff] %v930_v13  ;;  %968 = vmatmul.bf16.gmra.mxu3 %v816_v14 }
 0x23b   : > { %v931_v15 = vpop.f32.mrf.mxu2 }
 0x23c   : > { %v932_v16 = vadd.f32 %v1550_v11, %v931_v15 }
 0x23e   : > { %989 = vst [vmem:[%s1555_s23 + $0x78] sm:$0xff] %v932_v16 }
 0x243   : > { %v934_v17 = vpop.f32.mrf.mxu2 }
 0x244   : > { %v935_v18 = vadd.f32 %v1550_v11, %v934_v17 }
 0x246   : > { %990 = vst [vmem:[%s1555_s23 + $0x80] sm:$0xff] %v935_v18 }
 0x24b   : > { %v936_v19 = vpop.f32.mrf.mxu2 }
 0x24c   : > { %v937_v45 = vadd.f32 %v1550_v11, %v936_v19 }
 0x24e   : > { %991 = vst [vmem:[%s1555_s23 + $0x88] sm:$0xff] %v937_v45 }
 0x253   : > { %v939_v20 = vpop.f32.mrf.mxu2 }
 0x254   : > { %v940_v21 = vadd.f32 %v1550_v11, %v939_v20 }
 0x256   : > { %992 = vst [vmem:[%s1555_s23 + $0x90] sm:$0xff] %v940_v21 }
 0x25b   : > { %v941_v22 = vpop.f32.mrf.mxu2 }
 0x25c   : > { %v942_v23 = vadd.f32 %v1550_v11, %v941_v22 }
 0x25e   : > { %993 = vst [vmem:[%s1555_s23 + $0x98] sm:$0xff] %v942_v23 }
 0x263   : > { %v944_v24 = vpop.f32.mrf.mxu2 }
 0x264   : > { %v945_v25 = vadd.f32 %v1550_v11, %v944_v24 }
 0x266   : > { %994 = vst [vmem:[%s1555_s23 + $0xa0] sm:$0xff] %v945_v25 }
 0x26b   : > { %v946_v26 = vpop.f32.mrf.mxu2 }
 0x26c   : > { %v947_v27 = vadd.f32 %v1550_v11, %v946_v26 }
 0x26e   : > { %995 = vst [vmem:[%s1555_s23 + $0xa8] sm:$0xff] %v947_v27 }
 0x273   : > { %v949_v29 = vpop.f32.mrf.mxu2 }
 0x274   : > { %v950_v30 = vadd.f32 %v1550_v11, %v949_v29 }
 0x276   : > { %996 = vst [vmem:[%s1555_s23 + $0xb0] sm:$0xff] %v950_v30 }
 0x27b   : > { %v951_v31 = vpop.f32.mrf.mxu2 }
 0x27c   : > { %v952_v32 = vadd.f32 %v1550_v11, %v951_v31 }
 0x27e   : > { %997 = vst [vmem:[%s1555_s23 + $0xb8] sm:$0xff] %v952_v32 }
 0x289   : > { %v954_v33 = vpop.f32.mrf.mxu3 }
 0x28a   : > { %v955_v34 = vadd.f32 %v1550_v11, %v954_v33 }
 0x28c   : > { %998 = vst [vmem:[%s1555_s23 + $0xc0] sm:$0xff] %v955_v34 }
 0x291   : > { %v956_v35 = vpop.f32.mrf.mxu3 }
 0x292   : > { %v957_v36 = vadd.f32 %v1550_v11, %v956_v35 }
 0x294   : > { %999 = vst [vmem:[%s1555_s23 + $0xc8] sm:$0xff] %v957_v36 }
 0x299   : > { %v959_v37 = vpop.f32.mrf.mxu3 }
 0x29a   : > { %v960_v38 = vadd.f32 %v1550_v11, %v959_v37 }
 0x29c   : > { %1000 = vst [vmem:[%s1555_s23 + $0xd0] sm:$0xff] %v960_v38 }
 0x2a1   : > { %v961_v39 = vpop.f32.mrf.mxu3 }
 0x2a2   : > { %v962_v40 = vadd.f32 %v1550_v11, %v961_v39 }
 0x2a4   : > { %1001 = vst [vmem:[%s1555_s23 + $0xd8] sm:$0xff] %v962_v40 }
 0x2a9   : > { %v964_v41 = vpop.f32.mrf.mxu3 }
 0x2aa   : > { %v965_v42 = vadd.f32 %v1550_v11, %v964_v41 }
 0x2ac   : > { %1002 = vst [vmem:[%s1555_s23 + $0xe0] sm:$0xff] %v965_v42 }
 0x2b1   : > { %v966_v43 = vpop.f32.mrf.mxu3 }
 0x2b2   : > { %v967_v44 = vadd.f32 %v1550_v11, %v966_v43 }
 0x2b4   : > { %1003 = vst [vmem:[%s1555_s23 + $0xe8] sm:$0xff] %v967_v44 }
 0x2b9   : > { %v969_v46 = vpop.f32.mrf.mxu3 }
 0x2ba   : > { %v970_v47 = vadd.f32 %v1550_v11, %v969_v46 }
 0x2bc   : > { %1004 = vst [vmem:[%s1555_s23 + $0xf0] sm:$0xff] %v970_v47 }
 0x2c1   : > { %v971_v48 = vpop.f32.mrf.mxu3 }
 0x2c2   : > { %v972_v49 = vadd.f32 %v1550_v11, %v971_v48 }
 0x2c4   : > { %1005 = vst [vmem:[%s1555_s23 + $0xf8] sm:$0xff] %v972_v49 }
 0x2c5 PF: > { %s17_s24 = sadd.s32 1, %s1324_s24  }
 0x2c6   : > { %p14_p4 = scmp.ge.s32.totalorder %s17_s24, 4  }
 0x2c8   :  { %16 = sbr.rel (!%p14_p4) target bundleno = 1 (0x1), region = 78 }

</bundles_post_ra>
